<compile_context>
chip_gen: v5e
topology: v5e:2x2
jax: 0.10.0
libtpu: 0.0.40
codegen_flags: <defaults>
</compile_context>

<pallas_src>
import jax
import jax.numpy as jnp
from jax import lax
from jax.experimental import pallas as pl
from jax.experimental.pallas import tpu as pltpu


def decoder_kernel(enc_ref, h0_ref, c0_ref, dec_in_ref, lab_ref,
                   w_lstm_ref, b_lstm_ref,
                   w_wh_ref, w_ws_ref, b_ws_ref, vt_ref,
                   w_fc_ref, b_fc_ref, class_w_ref,
                   loss_ref, preds_ref,
                   h_scr, c_scr, wh_scr):
    t = pl.program_id(0)
    T = pl.num_programs(0)
    B, S, HS = enc_ref.shape                          # HS = 2 * hidden_dim
    H = wh_scr.shape[-1]
    V = class_w_ref.shape[-1]

    # ---- one-time init: state carry + time-invariant attent_wh(enc) hoist ----
    @pl.when(t == 0)
    def _init():
        h_scr[...] = h0_ref[...]
        c_scr[...] = c0_ref[...]
        enc_bf = enc_ref[...].astype(jnp.bfloat16)
        wh_scr[...] = jnp.dot(
            enc_bf.reshape(B * S, HS), w_wh_ref[...],
            preferred_element_type=jnp.float32).reshape(B, S, H)
        loss_ref[...] = jnp.zeros_like(loss_ref)

    x = dec_in_ref[0]                                 # (B, E) bf16 (teacher-forced embed)
    h = h_scr[...]                                    # (B, HS) f32
    c = c_scr[...]                                    # (B, HS) f32

    # ---- nn.LSTMCell, single fused gate matmul (PyTorch gate order i,f,g,o) ----
    xh = jnp.concatenate([x, h.astype(jnp.bfloat16)], axis=-1)       # (B, E+HS) bf16
    gates = (jnp.dot(xh, w_lstm_ref[...], preferred_element_type=jnp.float32)
             + b_lstm_ref[...])                                      # (B, 4*HS) f32
    i_g = jax.nn.sigmoid(gates[:, 0 * HS:1 * HS])
    f_g = jax.nn.sigmoid(gates[:, 1 * HS:2 * HS])
    g_g = jnp.tanh(gates[:, 2 * HS:3 * HS])
    o_g = jax.nn.sigmoid(gates[:, 3 * HS:4 * HS])
    c_new = f_g * c + i_g * g_g
    h_new = o_g * jnp.tanh(c_new)
    h_scr[...] = h_new
    c_scr[...] = c_new

    # ---- additive attention (get_context_vec); scores kept lane-dense (B,S) ----
    ws = (jnp.dot(h_new.astype(jnp.bfloat16), w_ws_ref[...],
                  preferred_element_type=jnp.float32)
          + b_ws_ref[...])                                           # (B, H)
    e = jnp.sum(jnp.tanh(wh_scr[...] + ws[:, None, :]) * vt_ref[...][None, :, :],
                axis=-1)                                             # (B, S)
    e = e - jnp.max(e, axis=-1, keepdims=True)                       # softmax over S
    ew = jnp.exp(e)
    att = ew / jnp.sum(ew, axis=-1, keepdims=True)                   # (B, S)
    ctx = jnp.sum(att[:, :, None] * enc_ref[...], axis=1)            # (B, HS) == bmm

    # ---- fcnn(cat([h, ctx], dim=1)), single fused projection ----
    hc = jnp.concatenate([h_new, ctx], axis=-1).astype(jnp.bfloat16)  # (B, 2*HS)
    logits = (jnp.dot(hc, w_fc_ref[...], preferred_element_type=jnp.float32)
              + b_fc_ref[...])                                        # (B, V) f32

    # ---- weighted CrossEntropyLoss(reduce=False): -w[y] * log_softmax[y] ----
    lab = lab_ref[0]                                                  # (B, 1) int32
    iota = lax.broadcasted_iota(jnp.int32, (B, V), 1)
    mask = iota == lab                                                # (B, V) one-hot mask
    mx = jnp.max(logits, axis=-1, keepdims=True)                      # (B, 1) reused below
    shifted = logits - mx
    logz = jnp.log(jnp.sum(jnp.exp(shifted), axis=-1, keepdims=True))  # (B, 1)
    w_y = jnp.sum(jnp.where(mask, class_w_ref[...], 0.0),
                  axis=-1, keepdims=True)                             # (B, 1)
    tgt = jnp.sum(jnp.where(mask, shifted, 0.0),
                  axis=-1, keepdims=True)                             # (B, 1)
    loss_ref[...] += w_y * (logz - tgt)

    # ---- greedy prediction: argmax(logits, dim=1), lowest index on ties ----
    is_max = logits == mx
    idx = jnp.min(jnp.where(is_max, iota, V), axis=-1, keepdims=True)  # (B, 1)
    preds_ref[...] = idx.astype(jnp.int32)[None]

    @pl.when(t == T - 1)
    def _final():
        loss_ref[...] = loss_ref[...] / T                             # all_loss / max_length


def decoder_forward(enc_outputs, h0, c0, labels, params, max_length):
    """Returns (per-example loss (B,), predicted token ids (B, max_length))."""
    B0, S, HS = enc_outputs.shape
    V, E = params["embed"].shape
    H = params["w_wh"].shape[0]
    T = max_length

    # Pad batch to a multiple of 8 (f32 sublane); padded rows are sliced off after.
    B = max(8, ((B0 + 7) // 8) * 8)
    pad = B - B0
    if pad:
        enc_outputs = jnp.pad(enc_outputs, ((0, pad), (0, 0), (0, 0)))
        h0 = jnp.pad(h0, ((0, pad), (0, 0)))
        c0 = jnp.pad(c0, ((0, pad), (0, 0)))
        labels = jnp.pad(labels, ((0, pad), (0, 0)))

    # Teacher-forced decoder inputs: <sos> then labels[:, :-1] (embedding gather as glue).
    dec_tokens = jnp.concatenate(
        [jnp.full((B, 1), params["SOS"], dtype=labels.dtype), labels[:, :T - 1]], axis=1)
    dec_in = jnp.transpose(params["embed"][dec_tokens], (1, 0, 2)).astype(jnp.bfloat16)  # (T,B,E)

    lab_tb1 = jnp.transpose(labels, (1, 0))[..., None].astype(jnp.int32)                 # (T,B,1)

    # Fused, transposed weights; MXU operands in bf16, biases/class weights f32.
    w_lstm_t = jnp.concatenate([params["w_ih"].T, params["w_hh"].T],
                               axis=0).astype(jnp.bfloat16)           # (E+HS, 4*HS)
    b_lstm = (params["b_ih"] + params["b_hh"]).reshape(1, -1).astype(jnp.float32)
    w_wh_t = params["w_wh"].T.astype(jnp.bfloat16)                    # (HS, H)
    w_ws_t = params["w_ws"].T.astype(jnp.bfloat16)                    # (HS, H)
    b_ws = params["b_ws"].reshape(1, -1).astype(jnp.float32)          # (1, H)
    vt = params["w_vt"].reshape(1, -1).astype(jnp.float32)            # (1, H)
    w_fc_t = params["w_fc"].T.astype(jnp.bfloat16)                    # (2*HS, V)
    b_fc = params["b_fc"].reshape(1, -1).astype(jnp.float32)          # (1, V)
    class_w = params["class_w"].reshape(1, -1).astype(jnp.float32)    # (1, V)

    grid_spec = pltpu.PrefetchScalarGridSpec(
        num_scalar_prefetch=0,
        grid=(T,),
        in_specs=[
            pl.BlockSpec((B, S, HS), lambda t: (0, 0, 0)),       # enc (resident)
            pl.BlockSpec((B, HS), lambda t: (0, 0)),             # h0
            pl.BlockSpec((B, HS), lambda t: (0, 0)),             # c0
            pl.BlockSpec((1, B, E), lambda t: (t, 0, 0)),        # dec_in (streamed per step)
            pl.BlockSpec((1, B, 1), lambda t: (t, 0, 0)),        # labels (streamed per step)
            pl.BlockSpec((E + HS, 4 * HS), lambda t: (0, 0)),    # fused LSTM weight
            pl.BlockSpec((1, 4 * HS), lambda t: (0, 0)),         # LSTM bias
            pl.BlockSpec((HS, H), lambda t: (0, 0)),             # attent_wh weight
            pl.BlockSpec((HS, H), lambda t: (0, 0)),             # attent_ws weight
            pl.BlockSpec((1, H), lambda t: (0, 0)),              # attent_ws bias
            pl.BlockSpec((1, H), lambda t: (0, 0)),              # attent_vt weight
            pl.BlockSpec((2 * HS, V), lambda t: (0, 0)),         # fused fcnn weight
            pl.BlockSpec((1, V), lambda t: (0, 0)),              # fcnn bias
            pl.BlockSpec((1, V), lambda t: (0, 0)),              # class weights
        ],
        out_specs=(
            pl.BlockSpec((B, 1), lambda t: (0, 0)),              # loss accumulator (resident)
            pl.BlockSpec((1, B, 1), lambda t: (t, 0, 0)),        # per-step preds
        ),
        scratch_shapes=[
            pltpu.VMEM((B, HS), jnp.float32),                    # h carry
            pltpu.VMEM((B, HS), jnp.float32),                    # c carry
            pltpu.VMEM((B, S, H), jnp.float32),                  # hoisted attent_wh(enc)
        ],
    )

    loss, preds = pl.pallas_call(
        decoder_kernel,
        out_shape=(jax.ShapeDtypeStruct((B, 1), jnp.float32),
                   jax.ShapeDtypeStruct((T, B, 1), jnp.int32)),
        grid_spec=grid_spec,
        compiler_params=pltpu.CompilerParams(
            dimension_semantics=("arbitrary",),
            vmem_limit_bytes=32 * 1024 * 1024),
    )(enc_outputs.astype(jnp.float32), h0.astype(jnp.float32), c0.astype(jnp.float32),
      dec_in, lab_tb1,
      w_lstm_t, b_lstm, w_wh_t, w_ws_t, b_ws, vt, w_fc_t, b_fc, class_w)

    preds_bt = jnp.transpose(preds[:, :, 0], (1, 0))             # (B, T)
    return loss[:B0, 0], preds_bt[:B0]


if __name__ == "__main__":
    key = jax.random.PRNGKey(0)
    B, S, T = 2, 8, 8         # batch, encoder seq len, max_length (small)
    H = 16                    # hidden_dim
    HS = 2 * H                # LSTMCell hidden size
    E = 16                    # input_dim (embedding dim)
    V = 32                    # vocab size
    PAD, SOS, EOS = 0, 1, 2

    keys = jax.random.split(key, 16)

    def init(k, shape, scale=0.1):
        return jax.random.normal(k, shape, jnp.float32) * scale

    params = {
        "embed": init(keys[0], (V, E)),
        "w_ih": init(keys[1], (4 * HS, E)),
        "w_hh": init(keys[2], (4 * HS, HS)),
        "b_ih": init(keys[3], (4 * HS,)),
        "b_hh": init(keys[4], (4 * HS,)),
        "w_fc": init(keys[5], (V, 2 * HS)),      # fcnn: (hidden*2 + hidden*2) -> V
        "b_fc": init(keys[6], (V,)),
        "w_wh": init(keys[7], (H, HS)),          # attent_wh (no bias)
        "w_ws": init(keys[8], (H, HS)),          # attent_ws (bias)
        "b_ws": init(keys[9], (H,)),
        "w_vt": init(keys[10], (1, H)),          # attent_vt (no bias)
        "class_w": jnp.ones((V,), jnp.float32).at[PAD].set(0.0),
        "SOS": SOS,
    }

    enc_outputs = init(keys[11], (B, S, HS), scale=1.0)
    h0 = init(keys[12], (B, HS), scale=1.0)
    c0 = init(keys[13], (B, HS), scale=1.0)
    labels = jax.random.randint(keys[14], (B, T), 0, V, dtype=jnp.int32)

    loss, preds = decoder_forward(enc_outputs, h0, c0, labels, params, max_length=T)
    jax.block_until_ready((loss, preds))
    assert loss.shape == (B,) and preds.shape == (B, T)
    assert bool(jnp.all(jnp.isfinite(loss)))
    print("KERNEL_OK")
</pallas_src>

<mosaic_0001>
module attributes {stable_mosaic.version = 11 : i64} {
  func.func @decoder_kernel(%arg0: i32, %arg1: memref<8x8x32xf32, #tpu.memory_space<vmem>>, %arg2: memref<8x32xf32, #tpu.memory_space<vmem>>, %arg3: memref<8x32xf32, #tpu.memory_space<vmem>>, %arg4: memref<1x8x16xbf16, #tpu.memory_space<vmem>>, %arg5: memref<1x8x1xi32, #tpu.memory_space<vmem>>, %arg6: memref<48x128xbf16, #tpu.memory_space<vmem>>, %arg7: memref<1x128xf32, #tpu.memory_space<vmem>>, %arg8: memref<32x16xbf16, #tpu.memory_space<vmem>>, %arg9: memref<32x16xbf16, #tpu.memory_space<vmem>>, %arg10: memref<1x16xf32, #tpu.memory_space<vmem>>, %arg11: memref<1x16xf32, #tpu.memory_space<vmem>>, %arg12: memref<64x32xbf16, #tpu.memory_space<vmem>>, %arg13: memref<1x32xf32, #tpu.memory_space<vmem>>, %arg14: memref<1x32xf32, #tpu.memory_space<vmem>>, %arg15: memref<8x1xf32, #tpu.memory_space<vmem>>, %arg16: memref<1x8x1xi32, #tpu.memory_space<vmem>>, %arg17: memref<8x32xf32, #tpu.memory_space<vmem>>, %arg18: memref<8x32xf32, #tpu.memory_space<vmem>>, %arg19: memref<8x8x16xf32, #tpu.memory_space<vmem>>) attributes {dimension_semantics = [#tpu.dimension_semantics<arbitrary>], iteration_bounds = array<i64: 8>, scalar_prefetch = 0 : i64, scratch_operands = 3 : i64, tpu.core_type = #tpu.core_type<tc>, window_params = [{pipeline_mode = #tpu.pipeline_mode<synchronous>, transform_indices = @transform_0, window_bounds = array<i64: 8, 8, 32>}, {pipeline_mode = #tpu.pipeline_mode<synchronous>, transform_indices = @transform_1, window_bounds = array<i64: 8, 32>}, {pipeline_mode = #tpu.pipeline_mode<synchronous>, transform_indices = @transform_2, window_bounds = array<i64: 8, 32>}, {transform_indices = @transform_3, window_bounds = array<i64: 1, 8, 16>}, {transform_indices = @transform_4, window_bounds = array<i64: 1, 8, 1>}, {pipeline_mode = #tpu.pipeline_mode<synchronous>, transform_indices = @transform_5, window_bounds = array<i64: 48, 128>}, {pipeline_mode = #tpu.pipeline_mode<synchronous>, transform_indices = @transform_6, window_bounds = array<i64: 1, 128>}, {pipeline_mode = #tpu.pipeline_mode<synchronous>, transform_indices = @transform_7, window_bounds = array<i64: 32, 16>}, {pipeline_mode = #tpu.pipeline_mode<synchronous>, transform_indices = @transform_8, window_bounds = array<i64: 32, 16>}, {pipeline_mode = #tpu.pipeline_mode<synchronous>, transform_indices = @transform_9, window_bounds = array<i64: 1, 16>}, {pipeline_mode = #tpu.pipeline_mode<synchronous>, transform_indices = @transform_10, window_bounds = array<i64: 1, 16>}, {pipeline_mode = #tpu.pipeline_mode<synchronous>, transform_indices = @transform_11, window_bounds = array<i64: 64, 32>}, {pipeline_mode = #tpu.pipeline_mode<synchronous>, transform_indices = @transform_12, window_bounds = array<i64: 1, 32>}, {pipeline_mode = #tpu.pipeline_mode<synchronous>, transform_indices = @transform_13, window_bounds = array<i64: 1, 32>}, {pipeline_mode = #tpu.pipeline_mode<synchronous>, transform_indices = @transform_14, window_bounds = array<i64: 8, 1>}, {transform_indices = @transform_15, window_bounds = array<i64: 1, 8, 1>}]} {
    %c0_i32 = arith.constant 0 : i32
    %0 = arith.cmpi eq, %arg0, %c0_i32 : i32
    %1 = arith.extui %0 : i1 to i32
    %c0_i32_0 = arith.constant 0 : i32
    %2 = arith.cmpi ne, %1, %c0_i32_0 : i32
    scf.if %2 {
      %c0_60 = arith.constant 0 : index
      %c0_61 = arith.constant 0 : index
      %118 = vector.load %arg2[%c0_60, %c0_61] : memref<8x32xf32, #tpu.memory_space<vmem>>, vector<8x32xf32>
      %c0_62 = arith.constant 0 : index
      %c0_63 = arith.constant 0 : index
      %119 = vector.load %arg17[%c0_62, %c0_63] : memref<8x32xf32, #tpu.memory_space<vmem>>, vector<8x32xf32>
      tpu.vector_store %arg17[%c0_62, %c0_63], %118 {strides = array<i32>} : memref<8x32xf32, #tpu.memory_space<vmem>>, vector<8x32xf32>,
      %c0_64 = arith.constant 0 : index
      %c0_65 = arith.constant 0 : index
      %120 = vector.load %arg3[%c0_64, %c0_65] : memref<8x32xf32, #tpu.memory_space<vmem>>, vector<8x32xf32>
      %c0_66 = arith.constant 0 : index
      %c0_67 = arith.constant 0 : index
      %121 = vector.load %arg18[%c0_66, %c0_67] : memref<8x32xf32, #tpu.memory_space<vmem>>, vector<8x32xf32>
      tpu.vector_store %arg18[%c0_66, %c0_67], %120 {strides = array<i32>} : memref<8x32xf32, #tpu.memory_space<vmem>>, vector<8x32xf32>,
      %c0_68 = arith.constant 0 : index
      %c0_69 = arith.constant 0 : index
      %c0_70 = arith.constant 0 : index
      %122 = vector.load %arg1[%c0_68, %c0_69, %c0_70] : memref<8x8x32xf32, #tpu.memory_space<vmem>>, vector<8x8x32xf32>
      %123 = arith.truncf %122 : vector<8x8x32xf32> to vector<8x8x32xbf16>
      %124 = vector.shape_cast %123 : vector<8x8x32xbf16> to vector<64x32xbf16>
      %c0_71 = arith.constant 0 : index
      %c0_72 = arith.constant 0 : index
      %125 = vector.load %arg8[%c0_71, %c0_72] : memref<32x16xbf16, #tpu.memory_space<vmem>>, vector<32x16xbf16>
      %cst_73 = arith.constant dense<0.000000e+00> : vector<64x16xf32>
      %126 = tpu.matmul %124, %125, %cst_73 {dimension_numbers = #tpu.dot_dimension_numbers<[1], [0], [0], [1], [0, 0, 1, 1], [], []>} : vector<64x32xbf16>, vector<32x16xbf16>, vector<64x16xf32> -> vector<64x16xf32>
      %127 = vector.shape_cast %126 : vector<64x16xf32> to vector<8x8x16xf32>
      %c0_74 = arith.constant 0 : index
      %c0_75 = arith.constant 0 : index
      %c0_76 = arith.constant 0 : index
      %128 = vector.load %arg19[%c0_74, %c0_75, %c0_76] : memref<8x8x16xf32, #tpu.memory_space<vmem>>, vector<8x8x16xf32>
      tpu.vector_store %arg19[%c0_74, %c0_75, %c0_76], %127 {strides = array<i32>} : memref<8x8x16xf32, #tpu.memory_space<vmem>>, vector<8x8x16xf32>,
      %cst_77 = arith.constant 0.000000e+00 : f32
      %129 = vector.broadcast %cst_77 : f32 to vector<8x1xf32>
      %c0_78 = arith.constant 0 : index
      %c0_79 = arith.constant 0 : index
      %130 = vector.load %arg15[%c0_78, %c0_79] : memref<8x1xf32, #tpu.memory_space<vmem>>, vector<8x1xf32>
      tpu.vector_store %arg15[%c0_78, %c0_79], %129 {strides = array<i32>} : memref<8x1xf32, #tpu.memory_space<vmem>>, vector<8x1xf32>,
    } else {
    }
    %c0 = arith.constant 0 : index
    %c0_1 = arith.constant 0 : index
    %c0_2 = arith.constant 0 : index
    %3 = vector.load %arg4[%c0, %c0_1, %c0_2] : memref<1x8x16xbf16, #tpu.memory_space<vmem>>, vector<1x8x16xbf16>
    %4 = vector.shape_cast %3 : vector<1x8x16xbf16> to vector<8x16xbf16>
    %c0_3 = arith.constant 0 : index
    %c0_4 = arith.constant 0 : index
    %5 = vector.load %arg17[%c0_3, %c0_4] : memref<8x32xf32, #tpu.memory_space<vmem>>, vector<8x32xf32>
    %c0_5 = arith.constant 0 : index
    %c0_6 = arith.constant 0 : index
    %6 = vector.load %arg18[%c0_5, %c0_6] : memref<8x32xf32, #tpu.memory_space<vmem>>, vector<8x32xf32>
    %7 = arith.truncf %5 : vector<8x32xf32> to vector<8x32xbf16>
    %8 = tpu.concatenate %4, %7 in 1 : vector<8x16xbf16>, vector<8x32xbf16> -> vector<8x48xbf16>
    %c0_7 = arith.constant 0 : index
    %c0_8 = arith.constant 0 : index
    %9 = vector.load %arg6[%c0_7, %c0_8] : memref<48x128xbf16, #tpu.memory_space<vmem>>, vector<48x128xbf16>
    %cst = arith.constant dense<0.000000e+00> : vector<8x128xf32>
    %10 = tpu.matmul %8, %9, %cst {dimension_numbers = #tpu.dot_dimension_numbers<[1], [0], [0], [1], [0, 0, 1, 1], [], []>} : vector<8x48xbf16>, vector<48x128xbf16>, vector<8x128xf32> -> vector<8x128xf32>
    %c0_9 = arith.constant 0 : index
    %c0_10 = arith.constant 0 : index
    %11 = vector.load %arg7[%c0_9, %c0_10] : memref<1x128xf32, #tpu.memory_space<vmem>>, vector<1x128xf32>
    %12 = vector.broadcast %11 : vector<1x128xf32> to vector<8x128xf32>
    %13 = arith.addf %10, %12 : vector<8x128xf32>
    %14 = vector.extract_strided_slice %13 {offsets = [0, 0], sizes = [8, 32], strides = [1, 1]} : vector<8x128xf32> to vector<8x32xf32>
    %15 = arith.negf %14 : vector<8x32xf32>
    %16 = math.exp %15 : vector<8x32xf32>
    %cst_11 = arith.constant 1.000000e+00 : f32
    %17 = vector.broadcast %cst_11 : f32 to vector<8x32xf32>
    %18 = arith.addf %17, %16 : vector<8x32xf32>
    %19 = arith.divf %17, %18 : vector<8x32xf32>
    %20 = vector.extract_strided_slice %13 {offsets = [0, 32], sizes = [8, 32], strides = [1, 1]} : vector<8x128xf32> to vector<8x32xf32>
    %21 = arith.negf %20 : vector<8x32xf32>
    %22 = math.exp %21 : vector<8x32xf32>
    %cst_12 = arith.constant 1.000000e+00 : f32
    %23 = vector.broadcast %cst_12 : f32 to vector<8x32xf32>
    %24 = arith.addf %23, %22 : vector<8x32xf32>
    %25 = arith.divf %23, %24 : vector<8x32xf32>
    %26 = vector.extract_strided_slice %13 {offsets = [0, 64], sizes = [8, 32], strides = [1, 1]} : vector<8x128xf32> to vector<8x32xf32>
    %27 = math.tanh %26 : vector<8x32xf32>
    %28 = vector.extract_strided_slice %13 {offsets = [0, 96], sizes = [8, 32], strides = [1, 1]} : vector<8x128xf32> to vector<8x32xf32>
    %29 = arith.negf %28 : vector<8x32xf32>
    %30 = math.exp %29 : vector<8x32xf32>
    %cst_13 = arith.constant 1.000000e+00 : f32
    %31 = vector.broadcast %cst_13 : f32 to vector<8x32xf32>
    %32 = arith.addf %31, %30 : vector<8x32xf32>
    %33 = arith.divf %31, %32 : vector<8x32xf32>
    %34 = arith.mulf %25, %6 : vector<8x32xf32>
    %35 = arith.mulf %19, %27 : vector<8x32xf32>
    %36 = arith.addf %34, %35 : vector<8x32xf32>
    %37 = math.tanh %36 : vector<8x32xf32>
    %38 = arith.mulf %33, %37 : vector<8x32xf32>
    %c0_14 = arith.constant 0 : index
    %c0_15 = arith.constant 0 : index
    %39 = vector.load %arg17[%c0_14, %c0_15] : memref<8x32xf32, #tpu.memory_space<vmem>>, vector<8x32xf32>
    tpu.vector_store %arg17[%c0_14, %c0_15], %38 {strides = array<i32>} : memref<8x32xf32, #tpu.memory_space<vmem>>, vector<8x32xf32>,
    %c0_16 = arith.constant 0 : index
    %c0_17 = arith.constant 0 : index
    %40 = vector.load %arg18[%c0_16, %c0_17] : memref<8x32xf32, #tpu.memory_space<vmem>>, vector<8x32xf32>
    tpu.vector_store %arg18[%c0_16, %c0_17], %36 {strides = array<i32>} : memref<8x32xf32, #tpu.memory_space<vmem>>, vector<8x32xf32>,
    %41 = arith.truncf %38 : vector<8x32xf32> to vector<8x32xbf16>
    %c0_18 = arith.constant 0 : index
    %c0_19 = arith.constant 0 : index
    %42 = vector.load %arg9[%c0_18, %c0_19] : memref<32x16xbf16, #tpu.memory_space<vmem>>, vector<32x16xbf16>
    %cst_20 = arith.constant dense<0.000000e+00> : vector<8x16xf32>
    %43 = tpu.matmul %41, %42, %cst_20 {dimension_numbers = #tpu.dot_dimension_numbers<[1], [0], [0], [1], [0, 0, 1, 1], [], []>} : vector<8x32xbf16>, vector<32x16xbf16>, vector<8x16xf32> -> vector<8x16xf32>
    %c0_21 = arith.constant 0 : index
    %c0_22 = arith.constant 0 : index
    %44 = vector.load %arg10[%c0_21, %c0_22] : memref<1x16xf32, #tpu.memory_space<vmem>>, vector<1x16xf32>
    %45 = vector.broadcast %44 : vector<1x16xf32> to vector<8x16xf32>
    %46 = arith.addf %43, %45 : vector<8x16xf32>
    %c0_23 = arith.constant 0 : index
    %c0_24 = arith.constant 0 : index
    %c0_25 = arith.constant 0 : index
    %47 = vector.load %arg19[%c0_23, %c0_24, %c0_25] : memref<8x8x16xf32, #tpu.memory_space<vmem>>, vector<8x8x16xf32>
    %48 = vector.shape_cast %46 : vector<8x16xf32> to vector<8x1x16xf32>
    %49 = vector.broadcast %48 : vector<8x1x16xf32> to vector<8x8x16xf32>
    %50 = arith.addf %47, %49 : vector<8x8x16xf32>
    %51 = math.tanh %50 : vector<8x8x16xf32>
    %c0_26 = arith.constant 0 : index
    %c0_27 = arith.constant 0 : index
    %52 = vector.load %arg11[%c0_26, %c0_27] : memref<1x16xf32, #tpu.memory_space<vmem>>, vector<1x16xf32>
    %53 = vector.shape_cast %52 : vector<1x16xf32> to vector<1x1x16xf32>
    %54 = vector.broadcast %53 : vector<1x1x16xf32> to vector<8x8x16xf32>
    %55 = arith.mulf %51, %54 : vector<8x8x16xf32>
    %cst_28 = arith.constant dense<0.000000e+00> : vector<8x8xf32>
    %56 = vector.multi_reduction <add>, %55, %cst_28 [2] : vector<8x8x16xf32> to vector<8x8xf32>
    %cst_29 = arith.constant dense<0xFF800000> : vector<8xf32>
    %57 = vector.multi_reduction <maximumf>, %56, %cst_29 [1] : vector<8x8xf32> to vector<8xf32>
    %58 = vector.shape_cast %57 : vector<8xf32> to vector<8x1xf32>
    %59 = vector.broadcast %58 : vector<8x1xf32> to vector<8x8xf32>
    %60 = arith.subf %56, %59 : vector<8x8xf32>
    %61 = math.exp %60 : vector<8x8xf32>
    %cst_30 = arith.constant dense<0.000000e+00> : vector<8xf32>
    %62 = vector.multi_reduction <add>, %61, %cst_30 [1] : vector<8x8xf32> to vector<8xf32>
    %63 = vector.shape_cast %62 : vector<8xf32> to vector<8x1xf32>
    %64 = vector.broadcast %63 : vector<8x1xf32> to vector<8x8xf32>
    %65 = arith.divf %61, %64 : vector<8x8xf32>
    %66 = vector.shape_cast %65 : vector<8x8xf32> to vector<8x8x1xf32>
    %c0_31 = arith.constant 0 : index
    %c0_32 = arith.constant 0 : index
    %c0_33 = arith.constant 0 : index
    %67 = vector.load %arg1[%c0_31, %c0_32, %c0_33] : memref<8x8x32xf32, #tpu.memory_space<vmem>>, vector<8x8x32xf32>
    %68 = vector.broadcast %66 : vector<8x8x1xf32> to vector<8x8x32xf32>
    %69 = arith.mulf %68, %67 : vector<8x8x32xf32>
    %cst_34 = arith.constant dense<0.000000e+00> : vector<8x32xf32>
    %70 = vector.multi_reduction <add>, %69, %cst_34 [1] : vector<8x8x32xf32> to vector<8x32xf32>
    %71 = tpu.concatenate %38, %70 in 1 : vector<8x32xf32>, vector<8x32xf32> -> vector<8x64xf32>
    %72 = arith.truncf %71 : vector<8x64xf32> to vector<8x64xbf16>
    %c0_35 = arith.constant 0 : index
    %c0_36 = arith.constant 0 : index
    %73 = vector.load %arg12[%c0_35, %c0_36] : memref<64x32xbf16, #tpu.memory_space<vmem>>, vector<64x32xbf16>
    %cst_37 = arith.constant dense<0.000000e+00> : vector<8x32xf32>
    %74 = tpu.matmul %72, %73, %cst_37 {dimension_numbers = #tpu.dot_dimension_numbers<[1], [0], [0], [1], [0, 0, 1, 1], [], []>} : vector<8x64xbf16>, vector<64x32xbf16>, vector<8x32xf32> -> vector<8x32xf32>
    %c0_38 = arith.constant 0 : index
    %c0_39 = arith.constant 0 : index
    %75 = vector.load %arg13[%c0_38, %c0_39] : memref<1x32xf32, #tpu.memory_space<vmem>>, vector<1x32xf32>
    %76 = vector.broadcast %75 : vector<1x32xf32> to vector<8x32xf32>
    %77 = arith.addf %74, %76 : vector<8x32xf32>
    %c0_40 = arith.constant 0 : index
    %c0_41 = arith.constant 0 : index
    %c0_42 = arith.constant 0 : index
    %78 = vector.load %arg5[%c0_40, %c0_41, %c0_42] : memref<1x8x1xi32, #tpu.memory_space<vmem>>, vector<1x8x1xi32>
    %79 = vector.shape_cast %78 : vector<1x8x1xi32> to vector<8x1xi32>
    %80 = tpu.iota {dimensions = array<i32: 1>} : vector<8x32xi32>
    %81 = vector.broadcast %79 : vector<8x1xi32> to vector<8x32xi32>
    %82 = arith.cmpi eq, %80, %81 : vector<8x32xi32>
    %cst_43 = arith.constant dense<0xFF800000> : vector<8xf32>
    %83 = vector.multi_reduction <maximumf>, %77, %cst_43 [1] : vector<8x32xf32> to vector<8xf32>
    %84 = vector.shape_cast %83 : vector<8xf32> to vector<8x1xf32>
    %85 = vector.broadcast %84 : vector<8x1xf32> to vector<8x32xf32>
    %86 = arith.subf %77, %85 : vector<8x32xf32>
    %87 = math.exp %86 : vector<8x32xf32>
    %cst_44 = arith.constant dense<0.000000e+00> : vector<8xf32>
    %88 = vector.multi_reduction <add>, %87, %cst_44 [1] : vector<8x32xf32> to vector<8xf32>
    %89 = vector.shape_cast %88 : vector<8xf32> to vector<8x1xf32>
    %90 = math.log %89 : vector<8x1xf32>
    %c0_45 = arith.constant 0 : index
    %c0_46 = arith.constant 0 : index
    %91 = vector.load %arg14[%c0_45, %c0_46] : memref<1x32xf32, #tpu.memory_space<vmem>>, vector<1x32xf32>
    %cst_47 = arith.constant 0.000000e+00 : f32
    %92 = vector.shape_cast %91 : vector<1x32xf32> to vector<1x32xf32>
    %93 = vector.broadcast %92 : vector<1x32xf32> to vector<8x32xf32>
    %94 = vector.broadcast %cst_47 : f32 to vector<8x32xf32>
    %95 = arith.select %82, %93, %94 : vector<8x32xi1>, vector<8x32xf32>
    %cst_48 = arith.constant dense<0.000000e+00> : vector<8xf32>
    %96 = vector.multi_reduction <add>, %95, %cst_48 [1] : vector<8x32xf32> to vector<8xf32>
    %97 = vector.shape_cast %96 : vector<8xf32> to vector<8x1xf32>
    %cst_49 = arith.constant 0.000000e+00 : f32
    %98 = vector.broadcast %cst_49 : f32 to vector<8x32xf32>
    %99 = arith.select %82, %86, %98 : vector<8x32xi1>, vector<8x32xf32>
    %cst_50 = arith.constant dense<0.000000e+00> : vector<8xf32>
    %100 = vector.multi_reduction <add>, %99, %cst_50 [1] : vector<8x32xf32> to vector<8xf32>
    %101 = vector.shape_cast %100 : vector<8xf32> to vector<8x1xf32>
    %c0_51 = arith.constant 0 : index
    %c0_52 = arith.constant 0 : index
    %102 = vector.load %arg15[%c0_51, %c0_52] : memref<8x1xf32, #tpu.memory_space<vmem>>, vector<8x1xf32>
    %103 = arith.subf %90, %101 : vector<8x1xf32>
    %104 = arith.mulf %97, %103 : vector<8x1xf32>
    %105 = arith.addf %102, %104 : vector<8x1xf32>
    %c0_53 = arith.constant 0 : index
    %c0_54 = arith.constant 0 : index
    %106 = vector.load %arg15[%c0_53, %c0_54] : memref<8x1xf32, #tpu.memory_space<vmem>>, vector<8x1xf32>
    tpu.vector_store %arg15[%c0_53, %c0_54], %105 {strides = array<i32>} : memref<8x1xf32, #tpu.memory_space<vmem>>, vector<8x1xf32>,
    %107 = vector.broadcast %84 : vector<8x1xf32> to vector<8x32xf32>
    %108 = arith.cmpf oeq, %77, %107 : vector<8x32xf32>
    %c32_i32 = arith.constant 32 : i32
    %109 = vector.broadcast %c32_i32 : i32 to vector<8x32xi32>
    %110 = arith.select %108, %80, %109 : vector<8x32xi1>, vector<8x32xi32>
    %cst_55 = arith.constant dense<2147483647> : vector<8xi32>
    %111 = vector.multi_reduction <minsi>, %110, %cst_55 [1] : vector<8x32xi32> to vector<8xi32>
    %112 = vector.shape_cast %111 : vector<8xi32> to vector<8x1xi32>
    %113 = vector.shape_cast %112 : vector<8x1xi32> to vector<1x8x1xi32>
    %c0_56 = arith.constant 0 : index
    %c0_57 = arith.constant 0 : index
    %c0_58 = arith.constant 0 : index
    %114 = vector.load %arg16[%c0_56, %c0_57, %c0_58] : memref<1x8x1xi32, #tpu.memory_space<vmem>>, vector<1x8x1xi32>
    tpu.vector_store %arg16[%c0_56, %c0_57, %c0_58], %113 {strides = array<i32>} : memref<1x8x1xi32, #tpu.memory_space<vmem>>, vector<1x8x1xi32>,
    %c7_i32 = arith.constant 7 : i32
    %115 = arith.cmpi eq, %arg0, %c7_i32 : i32
    %116 = arith.extui %115 : i1 to i32
    %c0_i32_59 = arith.constant 0 : i32
    %117 = arith.cmpi ne, %116, %c0_i32_59 : i32
    scf.if %117 {
      %c0_60 = arith.constant 0 : index
      %c0_61 = arith.constant 0 : index
      %118 = vector.load %arg15[%c0_60, %c0_61] : memref<8x1xf32, #tpu.memory_space<vmem>>, vector<8x1xf32>
      %cst_62 = arith.constant 8.000000e+00 : f32
      %119 = vector.broadcast %cst_62 : f32 to vector<8x1xf32>
      %120 = arith.divf %118, %119 : vector<8x1xf32>
      %c0_63 = arith.constant 0 : index
      %c0_64 = arith.constant 0 : index
      %121 = vector.load %arg15[%c0_63, %c0_64] : memref<8x1xf32, #tpu.memory_space<vmem>>, vector<8x1xf32>
      tpu.vector_store %arg15[%c0_63, %c0_64], %120 {strides = array<i32>} : memref<8x1xf32, #tpu.memory_space<vmem>>, vector<8x1xf32>,
    } else {
    }
    return
  }
  func.func @transform_0(%arg0: i32) -> (i32, i32, i32) {
    %c0_i32 = arith.constant 0 : i32
    %c0_i32_0 = arith.constant 0 : i32
    %c0_i32_1 = arith.constant 0 : i32
    %c0_i32_2 = arith.constant 0 : i32
    return %c0_i32, %c0_i32_0, %c0_i32_1 : i32, i32, i32
  }
  func.func @transform_1(%arg0: i32) -> (i32, i32) {
    %c0_i32 = arith.constant 0 : i32
    %c0_i32_0 = arith.constant 0 : i32
    %c0_i32_1 = arith.constant 0 : i32
    return %c0_i32, %c0_i32_0 : i32, i32
  }
  func.func @transform_2(%arg0: i32) -> (i32, i32) {
    %c0_i32 = arith.constant 0 : i32
    %c0_i32_0 = arith.constant 0 : i32
    %c0_i32_1 = arith.constant 0 : i32
    return %c0_i32, %c0_i32_0 : i32, i32
  }
  func.func @transform_3(%arg0: i32) -> (i32, i32, i32) {
    %c0_i32 = arith.constant 0 : i32
    %c0_i32_0 = arith.constant 0 : i32
    %c0_i32_1 = arith.constant 0 : i32
    return %arg0, %c0_i32, %c0_i32_0 : i32, i32, i32
  }
  func.func @transform_4(%arg0: i32) -> (i32, i32, i32) {
    %c0_i32 = arith.constant 0 : i32
    %c0_i32_0 = arith.constant 0 : i32
    %c0_i32_1 = arith.constant 0 : i32
    return %arg0, %c0_i32, %c0_i32_0 : i32, i32, i32
  }
  func.func @transform_5(%arg0: i32) -> (i32, i32) {
    %c0_i32 = arith.constant 0 : i32
    %c0_i32_0 = arith.constant 0 : i32
    %c0_i32_1 = arith.constant 0 : i32
    return %c0_i32, %c0_i32_0 : i32, i32
  }
  func.func @transform_6(%arg0: i32) -> (i32, i32) {
    %c0_i32 = arith.constant 0 : i32
    %c0_i32_0 = arith.constant 0 : i32
    %c0_i32_1 = arith.constant 0 : i32
    return %c0_i32, %c0_i32_0 : i32, i32
  }
  func.func @transform_7(%arg0: i32) -> (i32, i32) {
    %c0_i32 = arith.constant 0 : i32
    %c0_i32_0 = arith.constant 0 : i32
    %c0_i32_1 = arith.constant 0 : i32
    return %c0_i32, %c0_i32_0 : i32, i32
  }
  func.func @transform_8(%arg0: i32) -> (i32, i32) {
    %c0_i32 = arith.constant 0 : i32
    %c0_i32_0 = arith.constant 0 : i32
    %c0_i32_1 = arith.constant 0 : i32
    return %c0_i32, %c0_i32_0 : i32, i32
  }
  func.func @transform_9(%arg0: i32) -> (i32, i32) {
    %c0_i32 = arith.constant 0 : i32
    %c0_i32_0 = arith.constant 0 : i32
    %c0_i32_1 = arith.constant 0 : i32
    return %c0_i32, %c0_i32_0 : i32, i32
  }
  func.func @transform_10(%arg0: i32) -> (i32, i32) {
    %c0_i32 = arith.constant 0 : i32
    %c0_i32_0 = arith.constant 0 : i32
    %c0_i32_1 = arith.constant 0 : i32
    return %c0_i32, %c0_i32_0 : i32, i32
  }
  func.func @transform_11(%arg0: i32) -> (i32, i32) {
    %c0_i32 = arith.constant 0 : i32
    %c0_i32_0 = arith.constant 0 : i32
    %c0_i32_1 = arith.constant 0 : i32
    return %c0_i32, %c0_i32_0 : i32, i32
  }
  func.func @transform_12(%arg0: i32) -> (i32, i32) {
    %c0_i32 = arith.constant 0 : i32
    %c0_i32_0 = arith.constant 0 : i32
    %c0_i32_1 = arith.constant 0 : i32
    return %c0_i32, %c0_i32_0 : i32, i32
  }
  func.func @transform_13(%arg0: i32) -> (i32, i32) {
    %c0_i32 = arith.constant 0 : i32
    %c0_i32_0 = arith.constant 0 : i32
    %c0_i32_1 = arith.constant 0 : i32
    return %c0_i32, %c0_i32_0 : i32, i32
  }
  func.func @transform_14(%arg0: i32) -> (i32, i32) {
    %c0_i32 = arith.constant 0 : i32
    %c0_i32_0 = arith.constant 0 : i32
    %c0_i32_1 = arith.constant 0 : i32
    return %c0_i32, %c0_i32_0 : i32, i32
  }
  func.func @transform_15(%arg0: i32) -> (i32, i32, i32) {
    %c0_i32 = arith.constant 0 : i32
    %c0_i32_0 = arith.constant 0 : i32
    %c0_i32_1 = arith.constant 0 : i32
    return %arg0, %c0_i32, %c0_i32_0 : i32, i32, i32
  }
}

</mosaic_0001>

<bundles_post_ra>
// kernel: tpu_custom_call.1
= control target key start
LH: loop header
LB: loop body
LE: loop exit
PB: predicated region body
PF: predicated region fallthrough
CT: control target
= control target key end

     0   :  { %s1701_s18 = smov 0   ;;  %s2087_s0 = inlined_call_operand.vmem [shape: f32[8,8,32], index: 0, kind: input, shape index: {}]   ;;  %s2088_s1 = inlined_call_operand.vmem [shape: f32[8,32], index: 1, kind: input, shape index: {}]   ;;  %s2089_s2 = inlined_call_operand.vmem [shape: f32[8,32], index: 2, kind: input, shape index: {}]   ;;  %s2090_s3 = inlined_call_operand.vmem [shape: bf16[8,8,16], index: 3, kind: input, shape index: {}]   ;;  %s2091_s4 = inlined_call_operand.vmem [shape: s32[8,8,1], index: 4, kind: input, shape index: {}]   ;;  %s2092_s5 = inlined_call_operand.vmem [shape: bf16[48,128], index: 5, kind: input, shape index: {}]   ;;  %s2093_s6 = inlined_call_operand.vmem [shape: f32[1,128], index: 6, kind: input, shape index: {}]   ;;  %s2094_s7 = inlined_call_operand.vmem [shape: bf16[32,16], index: 7, kind: input, shape index: {}]   ;;  %s2095_s8 = inlined_call_operand.vmem [shape: bf16[32,16], index: 8, kind: input, shape index: {}]   ;;  %s2096_s9 = inlined_call_operand.vmem [shape: f32[1,16], index: 9, kind: input, shape index: {}]   ;;  %s2097_s10 = inlined_call_operand.vmem [shape: f32[1,16], index: 10, kind: input, shape index: {}]   ;;  %s2098_s11 = inlined_call_operand.vmem [shape: bf16[64,32], index: 11, kind: input, shape index: {}]   ;;  %s2099_s12 = inlined_call_operand.vmem [shape: f32[1,32], index: 12, kind: input, shape index: {}]   ;;  %s2100_s13 = inlined_call_operand.vmem [shape: f32[1,32], index: 13, kind: input, shape index: {}]   ;;  %s2101_s14 = inlined_call_operand.vmem [shape: f32[8,1], index: 14, kind: output, shape index: {0}]   ;;  %s2102_s15 = inlined_call_operand.vmem [shape: s32[8,8,1], index: 15, kind: output, shape index: {1}]  }
   0x1 LB: > { %s1707_s19 = sadd.s32 4294967295, %s1612_s18   ;;  %p1444_p0 = scmp.ge.s32.totalorder %s1612_s18, 1  ;;  %s1612_s18 = sphi %s1701_s18, %s26_s18  }
   0x2   : > { %p443_p1 = scmp.lt.s32.totalorder %s1612_s18, 9 }
   0x4   : > { %p444_p2 = pnand %p1444_p0, %p443_p1 }
   0x5   : > { %p493_p3 = scmp.lt.s32.totalorder (!%p444_p2), %s1707_s19, 7  ;;  %p1448_p4 = scmp.ne.s32.totalorder (!%p444_p2), %s1707_s19, 0 }
   0x6   : > { %447 = sbr.rel (%p444_p2) target bundleno = 2304 (0x900), region = 76 }
   0xb   : > { %s494_s20 = scalar_select %p493_p3, %s1707_s19, 7 }
   0xc   : > { %509 = sbr.rel (%p1448_p4) target bundleno = 169 (0xa9), region = 80 }
   0xd   : > { %s1445_s21 = sshll.u32 %s494_s20, 2  ;;  %s1446_s22 = sshll.u32 %s494_s20, 3 }
   0xe   : > { %s1716_s25 = scalar_lea.vmem %s2090_s3, %s1445_s21  ;;  %s1721_s28 = scalar_lea.vmem %s2091_s4, %s1446_s22 }
   0xf   : > { %s1726_s16 = scalar_lea.vmem %s2102_s15, %s1446_s22 }
  0x11   : > { %v1505_v0 = vld [vmem:[%s2094_s7 + $0x8] sm:$0xff]  ;;  %v1504_v1 = vld [vmem:[%s2094_s7] sm:$0xff]  ;;  %vm511_vm0 = vcmask 261120   ;;  %v517_v8 = vld [vmem:[%s2087_s0 + $0x10] sm:$0xff]  ;;  %vm617_vm1 = vcmask 7168   ;;  %v1614_v32 = vmov 0.0  }
  0x12   : > { %v510_v2 = vld [vmem:[%s2088_s1] sm:$0xff]  ;;  %v516_v5 = vld [vmem:[%s2087_s0 + $0x8] sm:$0xff]  ;;  %585 = vmatpush.bf16.msra.mxu0 %v1505_v0  ;;  %1515 = vmatpush.bf16.msra.mxu1 %v1505_v0  ;;  %v518_v9 = vld [vmem:[%s2087_s0 + $0x18] sm:$0xff]  ;;  %v525_v11 = vpack.c.bf16 %v517_v8, %v517_v8  ;;  %618 = vst.msk [vmem:[%s2101_s14] sm:$0xff] %vm617_vm1, %v1614_v32  ;;  %vm608_vm2 = vcmask 130048  }
  0x13   : > { %512 = vst.msk [vmem:[#allocation2] sm:$0xff] %vm511_vm0, %v510_v2  ;;  %v513_v3 = vld [vmem:[%s2089_s2] sm:$0xff]  ;;  %v524_v7 = vpack.c.bf16 %v516_v5, %v516_v5  ;;  %1516 = vmatpush.bf16.msra.mxu2 %v1505_v0  ;;  %1517 = vmatpush.bf16.msra.mxu3 %v1505_v0  ;;  %v526_v12 = vpack.c.bf16 %v518_v9, %v518_v9  ;;  %v520_v13 = vld [vmem:[%s2087_s0 + $0x28] sm:$0xff]  ;;  %v521_v15 = vld [vmem:[%s2087_s0 + $0x30] sm:$0xff] }
  0x14   : > { %v515_v4 = vld [vmem:[%s2087_s0] sm:$0xff]  ;;  %514 = vst.msk [vmem:[#allocation3] sm:$0xff] %vm511_vm0, %v513_v3  ;;  %v522_v16 = vld [vmem:[%s2087_s0 + $0x38] sm:$0xff]  ;;  %v528_v19 = vpack.c.bf16 %v520_v13, %v520_v13  ;;  %v529_v20 = vpack.c.bf16 %v521_v15, %v521_v15  ;;  %v545_v21 = vunpack.c.l.b16 %v525_v11 }
  0x15   : > { %v523_v6 = vpack.c.bf16 %v515_v4, %v515_v4  ;;  %v519_v10 = vld [vmem:[%s2087_s0 + $0x20] sm:$0xff]  ;;  %v544_v18 = vunpack.c.l.b16 %v524_v7  ;;  %v546_v22 = vunpack.c.l.b16 %v526_v12  ;;  %v530_v24 = vpack.c.bf16 %v522_v16, %v522_v16 }
  0x16   : > { %v527_v14 = vpack.c.bf16 %v519_v10, %v519_v10  ;;  %586 = vmatpush.bf16.msra.mxu0 %v1504_v1  ;;  %1518 = vmatpush.bf16.msra.mxu1 %v1504_v1  ;;  %v548_v26 = vunpack.c.l.b16 %v528_v19  ;;  %v549_v27 = vunpack.c.l.b16 %v529_v20 }
  0x17   : > { %v543_v17 = vunpack.c.l.b16 %v523_v6  ;;  %1519 = vmatpush.bf16.msra.mxu2 %v1504_v1  ;;  %1520 = vmatpush.bf16.msra.mxu3 %v1504_v1  ;;  %v552_v28 = vpack.c.b16 %v546_v22, %v545_v21  ;;  %v550_v29 = vunpack.c.l.b16 %v530_v24 }
  0x18   : > { %v547_v23 = vunpack.c.l.b16 %v527_v14 }
  0x19   : > { %v551_v25 = vpack.c.b16 %v544_v18, %v543_v17  ;;  %1458 = vmatmul.msk.bf16.vlgmr.msra.gmra.mxu1 %vm511_vm0, %v552_v28  ;;  %v554_v31 = vpack.c.b16 %v550_v29, %v549_v27 }
  0x1a   : > { %v553_v30 = vpack.c.b16 %v548_v26, %v547_v23 }
  0x1b   : > { %1457 = vmatmul.msk.bf16.vlgmr.msra.gmra.mxu0 %vm511_vm0, %v551_v25  ;;  %1460 = vmatmul.msk.bf16.vlgmr.msra.gmra.mxu3 %vm511_vm0, %v554_v31 }
  0x1c   : > { %1459 = vmatmul.msk.bf16.vlgmr.msra.gmra.mxu2 %vm511_vm0, %v553_v30 }
  0x96   : > { %v593_v34 = vpop.f32.mrf.mxu1 }
  0x97   : > { %611 = vst.msk [vmem:[#allocation4 + $0x10] sm:$0xff] %vm608_vm2, %v593_v34 }
  0x98   : > { %v588_v33 = vpop.f32.mrf.mxu0 }
  0x99   : > { %609 = vst.msk [vmem:[#allocation4] sm:$0xff] %vm608_vm2, %v588_v33 }
  0x9e   : > { %v603_v36 = vpop.f32.mrf.mxu3  ;;  %v595_v38 = vpop.f32.mrf.mxu1 }
  0x9f   : > { %v598_v35 = vpop.f32.mrf.mxu2  ;;  %615 = vst.msk [vmem:[#allocation4 + $0x30] sm:$0xff] %vm608_vm2, %v603_v36 }
  0xa0   : > { %613 = vst.msk [vmem:[#allocation4 + $0x20] sm:$0xff] %vm608_vm2, %v598_v35  ;;  %v590_v37 = vpop.f32.mrf.mxu0 }
  0xa1   : > { %610 = vst.msk [vmem:[#allocation4 + $0x8] sm:$0xff] %vm608_vm2, %v590_v37 }
  0xa2   : > { %612 = vst.msk [vmem:[#allocation4 + $0x18] sm:$0xff] %vm608_vm2, %v595_v38 }
  0xa6   : > { %v605_v40 = vpop.f32.mrf.mxu3 }
  0xa7   : > { %v600_v39 = vpop.f32.mrf.mxu2  ;;  %616 = vst.msk [vmem:[#allocation4 + $0x38] sm:$0xff] %vm608_vm2, %v605_v40 }
  0xa8   : > { %614 = vst.msk [vmem:[#allocation4 + $0x28] sm:$0xff] %vm608_vm2, %v600_v39 }
  0xa9 PF: > { %v620_v41 = vld [vmem:[#allocation2] sm:$0xff]  ;;  %v1508_v42 = vld [vmem:[%s2092_s5 + $0x10] sm:$0xff]  ;;  %v1507_v44 = vld [vmem:[%s2092_s5 + $0x8] sm:$0xff]  ;;  %s1615_s23 = smov 16   ;;  %s1616_s21 = smov 32   ;;  %vm628_vm3 = vcmask 130048  }
  0xaa   : > { %v622_v43 = vpack.c.bf16 %v620_v41, %v620_v41  ;;  %668 = vmatpush.bf16.msra.mxu0 %v1508_v42  ;;  %v1506_v47 = vld [vmem:[%s2092_s5] sm:$0xff]  ;;  %v621_v48 = vld [vmem:[#allocation3] sm:$0xff]  ;;  %vm660_vm4 = vcmask 392192   ;;  %s1617_s22 = smov 64   ;;  %vm721_vm9 = vcmask 261120   ;;  %v768_v22 = vld [vmem:[#allocation4] sm:$0xff] }
  0xab   : > { %697 = vrot.lane.b32.xlu1 %v621_v48, %s1616_s21  ;;  %v619_v49 = vld [vmem:[%s1716_s25] sm:$0xf]  ;;  %v1510_v13 = vld [vmem:[%s2095_s8 + $0x8] sm:$0xff]  ;;  %v769_v28 = vld [vmem:[#allocation4 + $0x8] sm:$0xff]  ;;  %vm870_vm10 = vcmask 1041409   ;;  %vm872_vm11 = vcmask 1042434  }
  0xac   : > { %v624_v45 = vunpack.c.l.b16 %v622_v43  ;;  %v1539_v52 = vld [vmem:[%s2093_s6] ss:$0 sm:$0xff]  ;;  %761 = vmatpush.bf16.msra.mxu1 %v1510_v13  ;;  %v772_v29 = vld [vmem:[#allocation4 + $0x20] sm:$0xff]  ;;  %v771_v36 = vld [vmem:[#allocation4 + $0x18] sm:$0xff]  ;;  %vm874_vm12 = vcmask 1043459   ;;  %vm876_vm13 = vcmask 1044484  }
  0xad   : > { %v1509_v14 = vld [vmem:[%s2095_s8] sm:$0xff]  ;;  %vm878_vm14 = vcmask 1045509   ;;  %vm2104_vm15 = vcmask 1046534   ;;  %vm2103_vm0 = vcmask 1047559   ;;  %vm885_vm1 = vcmask 64512   ;;  %s1619_s29 = smov 96  }
  0xae   : > { %v625_v46 = vpack.c.b16 %v624_v45, %v624_v45  ;;  %669 = vmatpush.bf16.msra.mxu0 %v1507_v44  ;;  %v1540_v19 = vld [vmem:[%s2096_s9] ss:$0 sm:$0xff]  ;;  %p1501_p5 = scmp.ne.s32.totalorder %s1707_s19, 7 }
  0xaf   : > { %v770_v27 = vld [vmem:[#allocation4 + $0x10] sm:$0xff]  ;;  %v773_v43 = vld [vmem:[#allocation4 + $0x28] sm:$0xff] }
  0xb0   : > { %626 = vrot.lane.b32.xlu0 %v625_v46, %s1615_s23  ;;  %762 = vmatpush.bf16.msra.mxu1 %v1509_v14 }
  0xb2   : > { %670 = vmatpush.bf16.msra.mxu0 %v1506_v47  ;;  %v1541_v47 = vld [vmem:[%s2097_s10] ss:$0 sm:$0xff] }
 0x11d   : > { %v698_v8 = vpop.permute.xlu1 %697 }
 0x122   : > { %v627_v50 = vpop.permute.xlu0 %626 }
 0x123   : > { %v631_v51 = vsel %vm628_vm3, %v619_v49, %v627_v50  ;;  %v775_v50 = vld [vmem:[#allocation4 + $0x38] sm:$0xff] }
 0x124   : > { %1473 = vmatmul.msk.bf16.vlgmr.msra.gmra.mxu0 %vm660_vm4, %v631_v51 }
 0x1a1   : > { %v672_v53 = vpop.f32.mrf.mxu0 }
 0x1a2   : > { %v673_v54 = vadd.f32 %v1539_v52, %v672_v53 }
 0x1a4   : > { %1544 = vtanh.f32 %v673_v54  ;;  %v1474_v57 = vmul.f32 -1.442695, %v673_v54  ;;  %v774_v54 = vld [vmem:[#allocation4 + $0x30] sm:$0xff] }
 0x1a6   : > { %1546 = vpow2.f32 %v1474_v57 }
 0x1a9   : > { %v674_v55 = vpop.f32.mrf.mxu0 }
 0x1aa   : > { %v1545_v56 = vpop.eup %1544 }
 0x1ab   : > { %702 = vrot.lane.b32.xlu0 %v1545_v56, %s1617_s22 }
 0x1ac   : > { %v1547_v58 = vpop.eup %1546 }
 0x1ad   : > { %v679_v59 = vadd.f32 1.0, %v1547_v58 }
 0x1af   : > { %1548 = vrcp.f32 %v679_v59  ;;  %v691_v1 = vand.u32 2147483648, %v679_v59  ;;  %vm685_vm6 = vweird.f32 %v679_v59  ;;  %v689_v2 = vand.u32 2147483647, %v679_v59 }
 0x1b1   : > { %v692_v4 = vor.u32 1.1754944e-38, %v691_v1  ;;  %vm690_vm8 = vcmp.eq.f32.partialorder %v689_v2, 8.507059e+37 }
 0x1b5   : > { %v1549_v60 = vpop.eup %1548 }
 0x1b6   : > { %v681_v61 = vmul.f32 %v1549_v60, %v679_v59  ;;  %vm686_vm5 = vweird.f32 %v1549_v60 }
 0x1b7   : > { %vm687_vm7 = vmor %vm685_vm6, %vm686_vm5 }
 0x1b8   : > { %v682_v62 = vsub.f32 1.0, %v681_v61 }
 0x1ba   : > { %v683_v63 = vmul.f32 %v1549_v60, %v682_v62 }
 0x1bc   : > { %v684_v0 = vadd.f32 %v1549_v60, %v683_v63 }
 0x1be   : > { %v688_v3 = vsel %vm687_vm7, %v1549_v60, %v684_v0 }
 0x1bf   : > { %v693_v5 = vsel %vm690_vm8, %v692_v4, %v688_v3 }
 0x1c0   : > { %v700_v9 = vmul.f32 %v698_v8, %v693_v5 }
 0x21d   : > { %v703_v6 = vpop.permute.xlu0 %702 }
 0x21e   : > { %v705_v7 = vmul.f32 %v703_v6, %v693_v5 }
 0x220   : > { %707 = vrot.lane.b32.xlu1 %v705_v7, %s1616_s21 }
 0x292   : > { %v708_v10 = vpop.permute.xlu1 %707 }
 0x293   : > { %v1798_v11 = vadd.f32 %v708_v10, %v700_v9 }
 0x295   : > { %1550 = vtanh.f32 %v1798_v11 }
 0x29b   : > { %v1551_v12 = vpop.eup %1550 }
 0x29c   : > { %713 = vrot.lane.b32.xlu2 %v1551_v12, %s1617_s22 }
 0x2f6   : > { %v714_v15 = vpop.permute.xlu2 %713 }
 0x2f7   : > { %v1807_v16 = vmul.f32 %v714_v15, %v693_v5 }
 0x2f9   : > { %v728_v17 = vpack.c.bf16 %v1807_v16, %v1807_v16 }
 0x2fb   : > { %738 = vrot.lane.b32.xlu2 %v728_v17, %s1616_s21  ;;  %v860_v17 = vlaneseq }
 0x355   : > { %v739_v18 = vpop.permute.xlu2 %738 }
 0x356   : > { %1483 = vmatmul.msk.bf16.vlgmr.msra.gmra.mxu1 %vm721_vm9, %v739_v18 }
 0x3d3   : > { %v764_v20 = vpop.f32.mrf.mxu1 }
 0x3d4   : > { %v765_v21 = vadd.f32 %v1540_v19, %v764_v20 }
 0x3d6   : > { %v784_v23 = vperm.slane %v765_v21, 0  ;;  %v778_v24 = vrot.slane %v765_v21, 2  ;;  %v777_v25 = vrot.slane %v765_v21, 1  ;;  %v780_v26 = vrot.slane %v765_v21, 4 }
 0x3d7   : > { %v779_v30 = vrot.slane %v765_v21, 3  ;;  %v781_v31 = vrot.slane %v765_v21, 5  ;;  %v783_v39 = vrot.slane %v765_v21, 7  ;;  %v782_v46 = vrot.slane %v765_v21, 6 }
 0x3d8   : > { %v800_v32 = vadd.f32 %v784_v23, %v768_v22  ;;  %v786_v33 = vperm.slane %v778_v24, 0  ;;  %v785_v34 = vperm.slane %v777_v25, 0  ;;  %v788_v35 = vperm.slane %v780_v26, 0 }
 0x3d9   : > { %v787_v37 = vperm.slane %v779_v30, 0  ;;  %v789_v38 = vperm.slane %v781_v31, 0  ;;  %v791_v49 = vperm.slane %v783_v39, 0  ;;  %v790_v52 = vperm.slane %v782_v46, 0 }
 0x3da   : > { %1552 = vtanh.f32 %v800_v32  ;;  %v802_v40 = vadd.f32 %v786_v33, %v770_v27  ;;  %v801_v41 = vadd.f32 %v785_v34, %v769_v28  ;;  %v804_v42 = vadd.f32 %v788_v35, %v772_v29 }
 0x3db   : > { %v766_v44 = vpop.f32.mrf.mxu1  ;;  %v803_v45 = vadd.f32 %v787_v37, %v771_v36  ;;  %v805_v48 = vadd.f32 %v789_v38, %v773_v43  ;;  %v807_v56 = vadd.f32 %v791_v49, %v775_v50  ;;  %v806_v62 = vadd.f32 %v790_v52, %v774_v54 }
 0x3dc   : > { %1554 = vtanh.f32 %v802_v40  ;;  %v1827_v21 = vand.u32 127, %v860_v17  ;;  %v1618_v43 = vmov 0  }
 0x3dd   : > { %1556 = vtanh.f32 %v801_v41  ;;  %1538 = vset.pattern.permute.xlu1 %v1618_v43  ;;  %1537 = vset.pattern.permute.xlu0 %v1618_v43 }
 0x3de   : > { %1558 = vtanh.f32 %v804_v42  ;;  %1536 = vset.pattern.permute.xlu2 %v1618_v43 }
 0x3df   : > { %1560 = vtanh.f32 %v803_v45 }
 0x3e0   : > { %v1553_v51 = vpop.eup %1552  ;;  %1562 = vtanh.f32 %v805_v48 }
 0x3e1   : > { %v820_v53 = vmul.f32 %v1553_v51, %v1541_v47  ;;  %1564 = vtanh.f32 %v807_v56 }
 0x3e2   : > { %v1555_v55 = vpop.eup %1554  ;;  %1566 = vtanh.f32 %v806_v62 }
 0x3e3   : > { %v1557_v57 = vpop.eup %1556  ;;  %v828_v58 = vsel %vm628_vm3, %v820_v53, 0.0  ;;  %v822_v59 = vmul.f32 %v1555_v55, %v1541_v47 }
 0x3e4   : > { %v1559_v60 = vpop.eup %1558  ;;  %829 = vadd.xlane.f32.xlu0 %v828_v58  ;;  %v821_v61 = vmul.f32 %v1557_v57, %v1541_v47 }
 0x3e5   : > { %v834_v63 = vsel %vm628_vm3, %v822_v59, 0.0  ;;  %v1561_v0 = vpop.eup %1560  ;;  %v824_v3 = vmul.f32 %v1559_v60, %v1541_v47 }
 0x3e6   : > { %835 = vadd.xlane.f32.xlu2 %v834_v63  ;;  %v831_v1 = vsel %vm628_vm3, %v821_v61, 0.0  ;;  %v1563_v2 = vpop.eup %1562  ;;  %v823_v4 = vmul.f32 %v1561_v0, %v1541_v47 }
 0x3e7   : > { %832 = vadd.xlane.f32.xlu1 %v831_v1  ;;  %v825_v5 = vmul.f32 %v1563_v2, %v1541_v47  ;;  %v840_v6 = vsel %vm628_vm3, %v824_v3, 0.0  ;;  %v1565_v7 = vpop.eup %1564 }
 0x3e8   : > { %v837_v8 = vsel %vm628_vm3, %v823_v4, 0.0  ;;  %v1567_v9 = vpop.eup %1566  ;;  %v827_v12 = vmul.f32 %v1565_v7, %v1541_v47 }
 0x3e9   : > { %v843_v10 = vsel %vm628_vm3, %v825_v5, 0.0  ;;  %v826_v13 = vmul.f32 %v1567_v9, %v1541_v47 }
 0x3ea   : > { %v849_v14 = vsel %vm628_vm3, %v827_v12, 0.0 }
 0x3eb   : > { %v846_v15 = vsel %vm628_vm3, %v826_v13, 0.0 }
 0x3ec   : > { %841 = vadd.xlane.f32.xlu0 %v840_v6 }
 0x3ee   : > { %838 = vadd.xlane.f32.xlu2 %v837_v8 }
 0x3ef   : > { %844 = vadd.xlane.f32.xlu1 %v843_v10 }
 0x3f4   : > { %850 = vadd.xlane.f32.xlu0 %v849_v14 }
 0x3f6   : > { %847 = vadd.xlane.f32.xlu2 %v846_v15 }
 0x457   : > { %v830_v18 = vpop.xlane.xlu0 %829 }
 0x458   : > { %v862_v23 = vperm.slane %v830_v18, %v1827_v21 }
 0x459   : > { %v836_v19 = vpop.xlane.xlu2 %835 }
 0x45a   : > { %v833_v20 = vpop.xlane.xlu1 %832  ;;  %v864_v25 = vperm.slane %v836_v19, %v1827_v21 }
 0x45b   : > { %v863_v22 = vperm.slane %v833_v20, %v1827_v21 }
 0x45d   : > { %v871_v26 = vsel %vm870_vm10, %v863_v22, %v862_v23 }
 0x45e   : > { %v873_v29 = vsel %vm872_vm11, %v864_v25, %v871_v26 }
 0x45f   : > { %v842_v24 = vpop.xlane.xlu0 %841 }
 0x460   : > { %v866_v31 = vperm.slane %v842_v24, %v1827_v21 }
 0x461   : > { %v839_v27 = vpop.xlane.xlu2 %838 }
 0x462   : > { %v865_v28 = vperm.slane %v839_v27, %v1827_v21  ;;  %v845_v32 = vpop.xlane.xlu1 %844 }
 0x463   : > { %v867_v35 = vperm.slane %v845_v32, %v1827_v21 }
 0x464   : > { %v875_v30 = vsel %vm874_vm12, %v865_v28, %v873_v29 }
 0x465   : > { %v877_v34 = vsel %vm876_vm13, %v866_v31, %v875_v30 }
 0x466   : > { %v879_v39 = vsel %vm878_vm14, %v867_v35, %v877_v34 }
 0x467   : > { %v851_v33 = vpop.xlane.xlu0 %850 }
 0x468   : > { %v869_v38 = vperm.slane %v851_v33, %v1827_v21 }
 0x469   : > { %v848_v36 = vpop.xlane.xlu2 %847 }
 0x46a   : > { %v868_v37 = vperm.slane %v848_v36, %v1827_v21 }
 0x46c   : > { %v881_v40 = vsel %vm2104_vm15, %v868_v37, %v879_v39 }
 0x46d   : > { %v883_v41 = vsel %vm2103_vm0, %v869_v38, %v881_v40  ;;  %v1303_v40 = vld [vmem:[%s1721_s28] sm:$0xff] }
 0x46e   : > { %v886_v42 = vsel %vm885_vm1, %v883_v41, -inf }
 0x46f   : > { %887 = vmax.xlane.f32.xlu1 %v886_v42 }
 0x4e2   : > { %v888_v44 = vpop.xlane.xlu1 %887 }
 0x4e3   : > { %v892_v45 = vperm.slane %v888_v44, 2  ;;  %v891_v46 = vperm.slane %v888_v44, 1  ;;  %v890_v47 = vperm.slane %v888_v44, 0  ;;  %v894_v51 = vperm.slane %v888_v44, 4 }
 0x4e4   : > { %v893_v52 = vperm.slane %v888_v44, 3  ;;  %v896_v59 = vperm.slane %v888_v44, 6  ;;  %v895_v62 = vperm.slane %v888_v44, 5  ;;  %v897_v6 = vperm.slane %v888_v44, 7 }
 0x4e5   : > { %v908_v48 = vsub.f32 %v836_v19, %v892_v45  ;;  %v907_v49 = vsub.f32 %v833_v20, %v891_v46  ;;  %v906_v50 = vsub.f32 %v830_v18, %v890_v47  ;;  %v910_v56 = vsub.f32 %v842_v24, %v894_v51 }
 0x4e6   : > { %v909_v57 = vsub.f32 %v839_v27, %v893_v52  ;;  %v912_v1 = vsub.f32 %v848_v36, %v896_v59  ;;  %v911_v2 = vsub.f32 %v845_v32, %v895_v62  ;;  %v913_v8 = vsub.f32 %v851_v33, %v897_v6 }
 0x4e7   : > { %v918_v53 = vmul.f32 1.442695, %v908_v48  ;;  %v916_v54 = vmul.f32 1.442695, %v907_v49  ;;  %v914_v55 = vmul.f32 1.442695, %v906_v50 }
 0x4e8   : > { %v922_v58 = vmul.f32 1.442695, %v910_v56  ;;  %v920_v61 = vmul.f32 1.442695, %v909_v57  ;;  %v926_v3 = vmul.f32 1.442695, %v912_v1 }
 0x4e9   : > { %1568 = vpow2.f32 %v918_v53  ;;  %v924_v5 = vmul.f32 1.442695, %v911_v2  ;;  %v928_v10 = vmul.f32 1.442695, %v913_v8 }
 0x4ea   : > { %1570 = vpow2.f32 %v916_v54 }
 0x4eb   : > { %1572 = vpow2.f32 %v914_v55 }
 0x4ec   : > { %1574 = vpow2.f32 %v922_v58 }
 0x4ed   : > { %1576 = vpow2.f32 %v920_v61 }
 0x4ee   : > { %1578 = vpow2.f32 %v926_v3 }
 0x4ef   : > { %v1845_v60 = vpop.eup %1568  ;;  %1580 = vpow2.f32 %v924_v5 }
 0x4f0   : > { %v1847_v63 = vpop.eup %1570  ;;  %945 = vperm.xlu1 %1538, %v1845_v60   ;;  %1582 = vpow2.f32 %v928_v10 }
 0x4f1   : > { %v1850_v0 = vpop.eup %1572  ;;  %942 = vperm.xlu0 %1537, %v1847_v63  }
 0x4f2   : > { %939 = vperm.xlu2 %1536, %v1850_v0   ;;  %v1854_v4 = vpop.eup %1574 }
 0x4f3   : > { %v1857_v7 = vpop.eup %1576 }
 0x4f4   : > { %v1860_v9 = vpop.eup %1578 }
 0x4f5   : > { %v1863_v12 = vpop.eup %1580 }
 0x4f6   : > { %v1866_v13 = vpop.eup %1582 }
 0x4f8   : > { %951 = vperm.xlu1 %1538, %v1854_v4  }
 0x4fa   : > { %948 = vperm.xlu2 %1536, %v1857_v7  }
 0x500   : > { %957 = vperm.xlu1 %1538, %v1860_v9  }
 0x502   : > { %954 = vperm.xlu2 %1536, %v1863_v12  }
 0x50a   : > { %960 = vperm.xlu2 %1536, %v1866_v13  }
 0x54c   : > { %v940_v14 = vpop.permute.xlu2 %939 }
 0x54d   : > { %v962_v22 = vperm.slane %v940_v14, %v1827_v21 }
 0x554   : > { %v949_v15 = vpop.permute.xlu2 %948 }
 0x555   : > { %v965_v28 = vperm.slane %v949_v15, %v1827_v21 }
 0x55c   : > { %v955_v20 = vpop.permute.xlu2 %954 }
 0x55d   : > { %v967_v32 = vperm.slane %v955_v20, %v1827_v21 }
 0x562   : > { %v946_v17 = vpop.permute.xlu1 %945 }
 0x563   : > { %v943_v18 = vpop.permute.xlu0 %942  ;;  %v964_v23 = vperm.slane %v946_v17, %v1827_v21 }
 0x564   : > { %v963_v19 = vperm.slane %v943_v18, %v1827_v21  ;;  %v961_v30 = vpop.permute.xlu2 %960 }
 0x565   : > { %v969_v35 = vperm.slane %v961_v30, %v1827_v21 }
 0x566   : > { %v970_v24 = vsel %vm870_vm10, %v963_v19, %v962_v22 }
 0x567   : > { %v971_v26 = vsel %vm872_vm11, %v964_v23, %v970_v24 }
 0x568   : > { %v972_v29 = vsel %vm874_vm12, %v965_v28, %v971_v26 }
 0x56a   : > { %v952_v25 = vpop.permute.xlu1 %951 }
 0x56b   : > { %v966_v27 = vperm.slane %v952_v25, %v1827_v21 }
 0x56d   : > { %v973_v31 = vsel %vm876_vm13, %v966_v27, %v972_v29 }
 0x56e   : > { %v974_v36 = vsel %vm878_vm14, %v967_v32, %v973_v31 }
 0x572   : > { %v958_v33 = vpop.permute.xlu1 %957 }
 0x573   : > { %v968_v34 = vperm.slane %v958_v33, %v1827_v21 }
 0x575   : > { %v975_v37 = vsel %vm2104_vm15, %v968_v34, %v974_v36 }
 0x576   : > { %v976_v38 = vsel %vm2103_vm0, %v969_v35, %v975_v37 }
 0x577   : > { %v978_v39 = vsel %vm885_vm1, %v976_v38, 0.0 }
 0x578   : > { %979 = vadd.xlane.f32.xlu0 %v978_v39 }
 0x58c   : > { %1305 = vperm.xlu0 %1537, %v1303_v40  }
 0x5eb   : > { %v980_v41 = vpop.xlane.xlu0 %979 }
 0x5ec   : > { %v982_v42 = vperm.slane %v980_v41, 0  ;;  %v983_v43 = vperm.slane %v980_v41, 1  ;;  %v1886_v44 = vperm.slane %v980_v41, 2  ;;  %v1888_v45 = vperm.slane %v980_v41, 3 }
 0x5ed   : > { %v1890_v46 = vperm.slane %v980_v41, 4  ;;  %v1892_v47 = vperm.slane %v980_v41, 5  ;;  %v1898_v52 = vperm.slane %v980_v41, 7  ;;  %v1900_v55 = vperm.slane %v980_v41, 6 }
 0x5ee   : > { %1584 = vrcp.f32 %v982_v42  ;;  %v1022_v48 = vand.u32 2147483647, %v983_v43  ;;  %v1024_v49 = vand.u32 2147483648, %v983_v43  ;;  %v1007_v50 = vand.u32 2147483647, %v982_v42 }
 0x5ef   : > { %1586 = vrcp.f32 %v983_v43  ;;  %v1009_v53 = vand.u32 2147483648, %v982_v42  ;;  %vm1018_vm2 = vweird.f32 %v983_v43  ;;  %vm1003_vm4 = vweird.f32 %v982_v42 }
 0x5f0   : > { %1588 = vrcp.f32 %v1886_v44  ;;  %vm1904_vm3 = vcmp.eq.f32.partialorder %v1022_v48, 8.507059e+37  ;;  %v1025_v62 = vor.u32 1.1754944e-38, %v1024_v49  ;;  %vm1910_vm5 = vcmp.eq.f32.partialorder %v1007_v50, 8.507059e+37 }
 0x5f1   : > { %1590 = vrcp.f32 %v1888_v45  ;;  %v1010_v8 = vor.u32 1.1754944e-38, %v1009_v53  ;;  %v1054_v24 = vand.u32 2147483648, %v1888_v45  ;;  %v1039_v26 = vand.u32 2147483648, %v1886_v44 }
 0x5f2   : > { %1592 = vrcp.f32 %v1890_v46  ;;  %v1037_v39 = vand.u32 2147483647, %v1886_v44  ;;  %v1052_v41 = vand.u32 2147483647, %v1888_v45 }
 0x5f3   : > { %1594 = vrcp.f32 %v1892_v47  ;;  %v1055_v49 = vor.u32 1.1754944e-38, %v1054_v24 }
 0x5f4   : > { %v1585_v51 = vpop.eup %1584  ;;  %1596 = vrcp.f32 %v1898_v52 }
 0x5f5   : > { %v1587_v54 = vpop.eup %1586  ;;  %v999_v56 = vmul.f32 %v1585_v51, %v982_v42  ;;  %vm1004_vm6 = vweird.f32 %v1585_v51  ;;  %1598 = vrcp.f32 %v1900_v55 }
 0x5f6   : > { %v1902_v57 = vpop.eup %1588  ;;  %v1014_v58 = vmul.f32 %v1587_v54, %v983_v43  ;;  %vm1019_vm7 = vweird.f32 %v1587_v54  ;;  %vm1005_vm8 = vmor %vm1003_vm4, %vm1004_vm6  ;;  %vm1048_vm4 = vweird.f32 %v1888_v45  ;;  %vm1053_vm6 = vcmp.eq.f32.partialorder %v1052_v41, 8.507059e+37 }
 0x5f7   : > { %v1908_v61 = vpop.eup %1590  ;;  %v1000_v1 = vsub.f32 1.0, %v999_v56  ;;  %v1029_v3 = vmul.f32 %v1902_v57, %v1886_v44  ;;  %vm1034_vm1 = vweird.f32 %v1902_v57  ;;  %vm1020_vm0 = vmor %vm1018_vm2, %vm1019_vm7  ;;  %vm1033_vm2 = vweird.f32 %v1886_v44 }
 0x5f8   : > { %v1916_v5 = vpop.eup %1592  ;;  %v1015_v6 = vsub.f32 1.0, %v1014_v58  ;;  %v1044_v10 = vmul.f32 %v1908_v61, %v1888_v45  ;;  %vm1049_vm15 = vweird.f32 %v1908_v61  ;;  %v1040_v44 = vor.u32 1.1754944e-38, %v1039_v26 }
 0x5f9   : > { %v1921_v14 = vpop.eup %1594  ;;  %v1001_v15 = vmul.f32 %v1585_v51, %v1000_v1  ;;  %v1030_v17 = vsub.f32 1.0, %v1029_v3  ;;  %v1059_v18 = vmul.f32 %v1916_v5, %v1890_v46  ;;  %v1069_v58 = vand.u32 2147483648, %v1890_v46 }
 0x5fa   : > { %v1016_v19 = vmul.f32 %v1587_v54, %v1015_v6  ;;  %v1045_v20 = vsub.f32 1.0, %v1044_v10  ;;  %v1074_v22 = vmul.f32 %v1921_v14, %v1892_v47  ;;  %v1937_v32 = vpop.eup %1596  ;;  %vm1079_vm7 = vweird.f32 %v1921_v14 }
 0x5fb   : > { %v1002_v23 = vadd.f32 %v1585_v51, %v1001_v15  ;;  %v1031_v25 = vmul.f32 %v1902_v57, %v1030_v17  ;;  %v1060_v31 = vsub.f32 1.0, %v1059_v18  ;;  %v1956_v43 = vpop.eup %1598  ;;  %v1104_v45 = vmul.f32 %v1937_v32, %v1898_v52 }
 0x5fc   : > { %v1017_v27 = vadd.f32 %v1587_v54, %v1016_v19  ;;  %v1046_v28 = vmul.f32 %v1908_v61, %v1045_v20  ;;  %v1075_v36 = vsub.f32 1.0, %v1074_v22  ;;  %v1089_v56 = vmul.f32 %v1956_v43, %v1900_v55 }
 0x5fd   : > { %v1006_v29 = vsel %vm1005_vm8, %v1585_v51, %v1002_v23  ;;  %v1032_v30 = vadd.f32 %v1902_v57, %v1031_v25  ;;  %v1084_v51 = vand.u32 2147483648, %v1892_v47  ;;  %v1105_v59 = vsub.f32 1.0, %v1104_v45 }
 0x5fe   : > { %v1021_v33 = vsel %vm1020_vm0, %v1587_v54, %v1017_v27  ;;  %v1011_v34 = vsel %vm1910_vm5, %v1010_v8, %v1006_v29  ;;  %v1047_v35 = vadd.f32 %v1908_v61, %v1046_v28  ;;  %vm1035_vm0 = vmor %vm1033_vm2, %vm1034_vm1  ;;  %v1076_v48 = vmul.f32 %v1921_v14, %v1075_v36 }
 0x5ff   : > { %v1026_v37 = vsel %vm1904_vm3, %v1025_v62, %v1021_v33  ;;  %v1012_v38 = vmul.f32 %v1850_v0, %v1011_v34  ;;  %vm1050_vm5 = vmor %vm1048_vm4, %vm1049_vm15  ;;  %v1036_v42 = vsel %vm1035_vm0, %v1902_v57, %v1032_v30  ;;  %v1061_v0 = vmul.f32 %v1916_v5, %v1060_v31  ;;  %v1118_v30 = vld [vmem:[%s2087_s0] sm:$0xff]  ;;  %v1119_v31 = vld [vmem:[%s2087_s0 + $0x8] sm:$0xff] }
 0x600   : > { %v1027_v40 = vmul.f32 %v1847_v63, %v1026_v37  ;;  %v1051_v63 = vsel %vm1050_vm5, %v1908_v61, %v1047_v35  ;;  %vm1038_vm3 = vcmp.eq.f32.partialorder %v1037_v39, 8.507059e+37  ;;  %vm1064_vm15 = vweird.f32 %v1916_v5  ;;  %v1120_v37 = vld [vmem:[%s2087_s0 + $0x10] sm:$0xff] }
 0x601   : > { %1128 = vperm.xlu1 %1538, %v1012_v38   ;;  %v1041_v50 = vsel %vm1038_vm3, %v1040_v44, %v1036_v42  ;;  %v1056_v53 = vsel %vm1053_vm6, %v1055_v49, %v1051_v63  ;;  %v1062_v54 = vadd.f32 %v1916_v5, %v1061_v0  ;;  %v1077_v57 = vadd.f32 %v1921_v14, %v1076_v48  ;;  %v1123_v38 = vld [vmem:[%s2087_s0 + $0x28] sm:$0xff]  ;;  %v1125_v42 = vld [vmem:[%s2087_s0 + $0x38] sm:$0xff] }
 0x602   : > { %1133 = vperm.xlu2 %1536, %v1027_v40   ;;  %v1042_v61 = vmul.f32 %v1845_v60, %v1041_v50  ;;  %vm1063_vm8 = vweird.f32 %v1890_v46  ;;  %v1067_v62 = vand.u32 2147483647, %v1890_v46  ;;  %v1090_v1 = vsub.f32 1.0, %v1089_v56  ;;  %v1514_v48 = vld [vmem:[%s2098_s11 + $0x18] sm:$0xff] }
 0x603   : > { %v1057_v2 = vmul.f32 %v1857_v7, %v1056_v53  ;;  %vm1078_vm1 = vweird.f32 %v1892_v47  ;;  %v1082_v3 = vand.u32 2147483647, %v1892_v47  ;;  %vm1065_vm2 = vmor %vm1063_vm8, %vm1064_vm15  ;;  %v1070_v10 = vor.u32 1.1754944e-38, %v1069_v58  ;;  %1294 = vmatpush.bf16.msra.mxu2 %v1514_v48  ;;  %v1513_v53 = vld [vmem:[%s2098_s11 + $0x10] sm:$0xff] }
 0x604   : > { %vm1080_vm4 = vmor %vm1078_vm1, %vm1079_vm7  ;;  %v1066_v6 = vsel %vm1065_vm2, %v1916_v5, %v1062_v54  ;;  %v1091_v8 = vmul.f32 %v1956_v43, %v1090_v1  ;;  %v1106_v46 = vmul.f32 %v1937_v32, %v1105_v59  ;;  %v1085_v15 = vor.u32 1.1754944e-38, %v1084_v51  ;;  %v1122_v59 = vld [vmem:[%s2087_s0 + $0x20] sm:$0xff] }
 0x605   : > { %v1081_v60 = vsel %vm1080_vm4, %v1921_v14, %v1077_v57  ;;  %vm1068_vm0 = vcmp.eq.f32.partialorder %v1067_v62, 8.507059e+37  ;;  %vm1083_vm5 = vcmp.eq.f32.partialorder %v1082_v3, 8.507059e+37  ;;  %vm1094_vm3 = vweird.f32 %v1956_v43  ;;  %v1512_v3 = vld [vmem:[%s2098_s11 + $0x8] sm:$0xff] }
 0x606   : > { %v1071_v7 = vsel %vm1068_vm0, %v1070_v10, %v1066_v6  ;;  %v1086_v17 = vsel %vm1083_vm5, %v1085_v15, %v1081_v60  ;;  %v1092_v47 = vadd.f32 %v1956_v43, %v1091_v8  ;;  %v1107_v18 = vadd.f32 %v1937_v32, %v1106_v46 }
 0x607   : > { %vm1109_vm6 = vweird.f32 %v1937_v32  ;;  %v1099_v5 = vand.u32 2147483648, %v1900_v55  ;;  %v1072_v14 = vmul.f32 %v1854_v4, %v1071_v7  ;;  %v1114_v19 = vand.u32 2147483648, %v1898_v52  ;;  %1295 = vmatpush.bf16.msra.mxu2 %v1513_v53 }
 0x608   : > { %vm1093_vm15 = vweird.f32 %v1900_v55  ;;  %v1097_v20 = vand.u32 2147483647, %v1900_v55  ;;  %v1087_v22 = vmul.f32 %v1863_v12, %v1086_v17  ;;  %vm1108_vm7 = vweird.f32 %v1898_v52 }
 0x609   : > { %1138 = vperm.xlu1 %1538, %v1042_v61   ;;  %v1112_v23 = vand.u32 2147483647, %v1898_v52  ;;  %vm1095_vm8 = vmor %vm1093_vm15, %vm1094_vm3  ;;  %v1100_v25 = vor.u32 1.1754944e-38, %v1099_v5  ;;  %v1115_v26 = vor.u32 1.1754944e-38, %v1114_v19  ;;  %vm1335_vm5 = vcmask 7168  }
 0x60a   : > { %1143 = vperm.xlu2 %1536, %v1057_v2   ;;  %vm1110_vm1 = vmor %vm1108_vm7, %vm1109_vm6  ;;  %v1096_v24 = vsel %vm1095_vm8, %v1956_v43, %v1092_v47  ;;  %vm1098_vm2 = vcmp.eq.f32.partialorder %v1097_v20, 8.507059e+37  ;;  %v1124_v20 = vld [vmem:[%s2087_s0 + $0x30] sm:$0xff] }
 0x60b   : > { %v1111_v4 = vsel %vm1110_vm1, %v1937_v32, %v1107_v18  ;;  %vm1113_vm4 = vcmp.eq.f32.partialorder %v1112_v23, 8.507059e+37  ;;  %v1101_v27 = vsel %vm1098_vm2, %v1100_v25, %v1096_v24  ;;  %1296 = vmatpush.bf16.msra.mxu2 %v1512_v3 }
 0x60c   : > { %v1116_v55 = vsel %vm1113_vm4, %v1115_v26, %v1111_v4  ;;  %v1102_v12 = vmul.f32 %v1860_v9, %v1101_v27 }
 0x60d   : > { %v1117_v28 = vmul.f32 %v1866_v13, %v1116_v55  ;;  %v1121_v13 = vld [vmem:[%s2087_s0 + $0x18] sm:$0xff] }
 0x611   : > { %1148 = vperm.xlu1 %1538, %v1072_v14  }
 0x612   : > { %1153 = vperm.xlu2 %1536, %v1087_v22  }
 0x619   : > { %1158 = vperm.xlu1 %1538, %v1102_v12  }
 0x61a   : > { %1163 = vperm.xlu2 %1536, %v1117_v28  }
 0x621   : > { %718 = vrot.lane.b32.xlu1 %v1807_v16, %s1616_s21 }
 0x65c   : > { %v1134_v52 = vpop.permute.xlu2 %1133 }
 0x65d   : > { %v1167_v34 = vmul.f32 %v1134_v52, %v1119_v31 }
 0x65f   : > { %v1181_v35 = vsel %vm721_vm9, %v1167_v34, 0.0 }
 0x660   : > { %v1182_v41 = vrot.slane %v1181_v35, 4 }
 0x662   : > { %v1183_v54 = vadd.f32 %v1182_v41, %v1181_v35 }
 0x664   : > { %v1144_v29 = vpop.permute.xlu2 %1143  ;;  %v1184_v6 = vrot.slane %v1183_v54, 2 }
 0x665   : > { %v1169_v36 = vmul.f32 %v1144_v29, %v1121_v13 }
 0x666   : > { %v1185_v18 = vadd.f32 %v1184_v6, %v1183_v54  ;;  %v1306_v6 = vpop.permute.xlu0 %1305 }
 0x667   : > { %v1195_v63 = vsel %vm721_vm9, %v1169_v36, 0.0 }
 0x668   : > { %v1196_v56 = vrot.slane %v1195_v63, 4  ;;  %v1186_v26 = vrot.slane %v1185_v18, 1 }
 0x66a   : > { %v1197_v8 = vadd.f32 %v1196_v56, %v1195_v63  ;;  %v1511_v56 = vld [vmem:[%s2098_s11] sm:$0xff] }
 0x66b   : > { %1297 = vmatpush.bf16.msra.mxu2 %v1511_v56 }
 0x66c   : > { %v1154_v32 = vpop.permute.xlu2 %1153  ;;  %v1198_v5 = vrot.slane %v1197_v8, 2 }
 0x66d   : > { %v1171_v44 = vmul.f32 %v1154_v32, %v1123_v38 }
 0x66e   : > { %v1199_v27 = vadd.f32 %v1198_v5, %v1197_v8  ;;  %v1543_v5 = vld [vmem:[%s2100_s13] ss:$0 sm:$0xff] }
 0x66f   : > { %v1209_v57 = vsel %vm721_vm9, %v1171_v44, 0.0 }
 0x670   : > { %v1210_v60 = vrot.slane %v1209_v57, 4  ;;  %v1200_v34 = vrot.slane %v1199_v27, 1 }
 0x672   : > { %v1211_v14 = vadd.f32 %v1210_v60, %v1209_v57  ;;  %v1201_v41 = vadd.f32 %v1200_v34, %v1199_v27 }
 0x673   : > { %v1129_v33 = vpop.permute.xlu1 %1128 }
 0x674   : > { %v1166_v9 = vmul.f32 %v1129_v33, %v1118_v30  ;;  %v1164_v0 = vpop.permute.xlu2 %1163  ;;  %v1212_v55 = vrot.slane %v1211_v14, 2 }
 0x675   : > { %v1173_v50 = vmul.f32 %v1164_v0, %v1125_v42 }
 0x676   : > { %v1174_v16 = vsel %vm721_vm9, %v1166_v9, 0.0  ;;  %v1187_v9 = vadd.f32 %v1186_v26, %v1185_v18  ;;  %v1213_v13 = vadd.f32 %v1212_v55, %v1211_v14 }
 0x677   : > { %v1175_v39 = vrot.slane %v1174_v16, 4  ;;  %v1223_v62 = vsel %vm721_vm9, %v1173_v50, 0.0 }
 0x678   : > { %v1224_v46 = vrot.slane %v1223_v62, 4  ;;  %v1214_v42 = vrot.slane %v1213_v13, 1 }
 0x679   : > { %v1176_v45 = vadd.f32 %v1175_v39, %v1174_v16 }
 0x67a   : > { %v1225_v22 = vadd.f32 %v1224_v46, %v1223_v62 }
 0x67b   : > { %v1139_v40 = vpop.permute.xlu1 %1138  ;;  %v1177_v61 = vrot.slane %v1176_v45, 2 }
 0x67c   : > { %v1168_v43 = vmul.f32 %v1139_v40, %v1120_v37  ;;  %v1226_v52 = vrot.slane %v1225_v22, 2 }
 0x67d   : > { %v1178_v15 = vadd.f32 %v1177_v61, %v1176_v45  ;;  %v1215_v45 = vadd.f32 %v1214_v42, %v1213_v13  ;;  %v1542_v61 = vld [vmem:[%s2099_s12] ss:$0 sm:$0xff] }
 0x67e   : > { %v1188_v49 = vsel %vm721_vm9, %v1168_v43, 0.0  ;;  %v1227_v35 = vadd.f32 %v1226_v52, %v1225_v22  ;;  %v1331_v52 = vld [vmem:[%s2101_s14] sm:$0xff] }
 0x67f   : > { %v1189_v51 = vrot.slane %v1188_v49, 4  ;;  %v1179_v23 = vrot.slane %v1178_v15, 1 }
 0x680   : > { %v1228_v43 = vrot.slane %v1227_v35, 1 }
 0x681   : > { %v1190_v58 = vadd.f32 %v1189_v51, %v1188_v49  ;;  %v1180_v29 = vadd.f32 %v1179_v23, %v1178_v15 }
 0x682   : > { %v1229_v50 = vadd.f32 %v1228_v43, %v1227_v35 }
 0x683   : > { %v1191_v1 = vrot.slane %v1190_v58, 2  ;;  %v1149_v2 = vpop.permute.xlu1 %1148  ;;  %v1238_v36 = vsel %vm870_vm10, %v1187_v9, %v1180_v29  ;;  %vm2109_vm10 = vcmask 1046534  }
 0x684   : > { %v1170_v10 = vmul.f32 %v1149_v2, %v1122_v59 }
 0x685   : > { %v1192_v17 = vadd.f32 %v1191_v1, %v1190_v58 }
 0x686   : > { %v1202_v7 = vsel %vm721_vm9, %v1170_v10, 0.0 }
 0x687   : > { %v1203_v47 = vrot.slane %v1202_v7, 4  ;;  %v1193_v24 = vrot.slane %v1192_v17, 1 }
 0x689   : > { %v1204_v19 = vadd.f32 %v1203_v47, %v1202_v7  ;;  %v1194_v31 = vadd.f32 %v1193_v24, %v1192_v17 }
 0x68b   : > { %v1205_v4 = vrot.slane %v1204_v19, 2  ;;  %v1159_v25 = vpop.permute.xlu1 %1158  ;;  %v1239_v37 = vsel %vm872_vm11, %v1194_v31, %v1238_v36  ;;  %vm2110_vm11 = vcmask 1047559  }
 0x68c   : > { %v1172_v12 = vmul.f32 %v1159_v25, %v1124_v20  ;;  %v1240_v63 = vsel %vm874_vm12, %v1201_v41, %v1239_v37  ;;  %vm1286_vm12 = vcmask 523264  }
 0x68d   : > { %v1206_v28 = vadd.f32 %v1205_v4, %v1204_v19 }
 0x68e   : > { %v1216_v30 = vsel %vm721_vm9, %v1172_v12, 0.0 }
 0x68f   : > { %v1207_v32 = vrot.slane %v1206_v28, 1  ;;  %v1217_v33 = vrot.slane %v1216_v30, 4 }
 0x691   : > { %v1218_v16 = vadd.f32 %v1217_v33, %v1216_v30  ;;  %v1208_v38 = vadd.f32 %v1207_v32, %v1206_v28 }
 0x693   : > { %v1219_v39 = vrot.slane %v1218_v16, 2  ;;  %v719_v40 = vpop.permute.xlu1 %718  ;;  %v1241_v48 = vsel %vm876_vm13, %v1208_v38, %v1240_v63 }
 0x694   : > { %722 = vst.msk [vmem:[#allocation2] sm:$0xff] %vm721_vm9, %v719_v40  ;;  %v1242_v51 = vsel %vm878_vm14, %v1215_v45, %v1241_v48  ;;  %vm1307_vm14 = vcmp.eq.s32.totalorder %v1827_v21, %v1306_v6 }
 0x695   : > { %v1220_v0 = vadd.f32 %v1219_v39, %v1218_v16  ;;  %v1323_v20 = vsel %vm1307_vm14, %v1543_v5, 0.0 }
 0x697   : > { %v1221_v44 = vrot.slane %v1220_v0, 1 }
 0x699   : > { %v1222_v49 = vadd.f32 %v1221_v44, %v1220_v0 }
 0x69b   : > { %v1243_v53 = vsel %vm2109_vm10, %v1222_v49, %v1242_v51 }
 0x69c   : > { %v1244_v54 = vsel %vm2110_vm11, %v1229_v50, %v1243_v53 }
 0x69d   : > { %1245 = vrot.lane.b32.xlu2 %v1244_v54, %s1616_s21 }
 0x6f7   : > { %v1246_v57 = vpop.permute.xlu2 %1245 }
 0x6f8   : > { %v1248_v58 = vsel %vm721_vm9, %v719_v40, %v1246_v57 }
 0x6f9   : > { %v1249_v59 = vpack.c.bf16 %v1248_v58, %v1248_v58 }
 0x6fb   : > { %1500 = vmatmul.msk.bf16.vlgmr.msra.gmra.mxu2 %vm1286_vm12, %v1249_v59 }
 0x77e   : > { %v1299_v62 = vpop.f32.mrf.mxu2 }
 0x77f   : > { %v1300_v1 = vadd.f32 %v1542_v61, %v1299_v62 }
 0x781   : > { %v1308_v2 = vsel %vm721_vm9, %v1300_v1, -inf }
 0x782   : > { %1309 = vmax.xlane.f32.xlu1 %v1308_v2 }
 0x786   : > { %v1301_v3 = vpop.f32.mrf.mxu2 }
 0x7f5   : > { %v1310_v8 = vpop.xlane.xlu1 %1309 }
 0x7f6   : > { %v1311_v60 = vsub.f32 %v1300_v1, %v1310_v8  ;;  %vm1337_vm13 = vcmp.eq.f32.partialorder %v1300_v1, %v1310_v8 }
 0x7f7   : > { %v1338_v10 = vsel %vm1337_vm13, %v1827_v21, 32  ;;  %v1324_v21 = vsel %vm721_vm9, %v1323_v20, 0.0 }
 0x7f8   : > { %v1312_v46 = vmul.f32 1.442695, %v1311_v60  ;;  %v1327_v15 = vsel %vm1307_vm14, %v1311_v60, 0.0  ;;  %v1339_v7 = vsel %vm721_vm9, %v1338_v10, 2147483647 }
 0x7f9   : > { %v1328_v17 = vsel %vm721_vm9, %v1327_v15, 0.0  ;;  %v1341_v47 = vshra.s32 %v1339_v7, 16  ;;  %v1340_v22 = vand.u32 65535, %v1339_v7 }
 0x7fa   : > { %1600 = vpow2.f32 %v1312_v46  ;;  %1329 = vadd.xlane.f32.xlu1 %v1328_v17 }
 0x7fb   : > { %v1343_v18 = vcvt.s32.f32 %v1341_v47  ;;  %v1342_v24 = vcvt.s32.f32 %v1340_v22 }
 0x7fd   : > { %1344 = vmin.xlane.f32.xlu2 %v1343_v18 }
 0x800   : > { %v1601_v14 = vpop.eup %1600 }
 0x801   : > { %v1314_v19 = vsel %vm721_vm9, %v1601_v14, 0.0 }
 0x802   : > { %1315 = vadd.xlane.f32.xlu0 %v1314_v19 }
 0x805   : > { %1325 = vadd.xlane.f32.xlu2 %v1324_v21 }
 0x81d   : > { %724 = vrot.lane.b32.xlu2 %v1798_v11, %s1619_s29 }
 0x86d   : > { %v1330_v12 = vpop.xlane.xlu1 %1329 }
 0x870   : > { %v1345_v23 = vpop.xlane.xlu2 %1344 }
 0x871   : > { %vm1346_vm0 = vcmp.eq.f32.partialorder %v1343_v18, %v1345_v23  ;;  %v1351_v31 = vcvt.f32.s32 %v1345_v23 }
 0x872   : > { %v1347_v4 = vsel %vm1346_vm0, %v1342_v24, inf }
 0x873   : > { %1348 = vmin.xlane.f32.xlu1 %v1347_v4  ;;  %v1352_v33 = vshll.u32 %v1351_v31, 16 }
 0x875   : > { %v1316_v25 = vpop.xlane.xlu0 %1315 }
 0x876   : > { %1602 = vlog2.f32 %v1316_v25 }
 0x878   : > { %v1326_v26 = vpop.xlane.xlu2 %1325 }
 0x87c   : > { %v1603_v27 = vpop.eup %1602 }
 0x87d   : > { %v1318_v55 = vmul.f32 0.6931472, %v1603_v27 }
 0x87f   : > { %v1332_v28 = vsub.f32 %v1318_v55, %v1330_v12 }
 0x880   : > { %v725_v29 = vpop.permute.xlu2 %724 }
 0x881   : > { %v1333_v11 = vmul.f32 %v1332_v28, %v1326_v26  ;;  %727 = vst.msk [vmem:[#allocation3] sm:$0xff] %vm721_vm9, %v725_v29 }
 0x883   : > { %v1334_v30 = vadd.f32 %v1333_v11, %v1331_v52 }
 0x885   : > { %1336 = vst.msk [vmem:[%s2101_s14] sm:$0xff] %vm1335_vm5, %v1334_v30 }
 0x8e6   : > { %v1349_v32 = vpop.xlane.xlu1 %1348 }
 0x8e7   : > { %v1350_v9 = vcvt.f32.s32 %v1349_v32  ;;  %1358 = sbr.rel (%p1501_p5) target bundleno = 2304 (0x900), region = 84 }
 0x8e9   : > { %v1353_v34 = vadd.s32 %v1352_v33, %v1350_v9 }
 0x8eb   : > { %1354 = vst.msk [vmem:[%s1726_s16] sm:$0xff] %vm1335_vm5, %v1353_v34 }
 0x8ec   : > { %v1620_v13 = vmov 8.0   ;;  %v1359_v38 = vld [vmem:[%s2101_s14] sm:$0xff] }
 0x8ed   : > { %1604 = vrcp.f32 %v1620_v13 }
 0x8f3   : > { %v1605_v16 = vpop.eup %1604 }
 0x8f4   : > { %v1361_v35 = vmul.f32 8.0, %v1605_v16  ;;  %vm1365_vm9 = vweird.f32 %v1605_v16 }
 0x8f6   : > { %v1362_v36 = vsub.f32 1.0, %v1361_v35 }
 0x8f8   : > { %v1363_v37 = vmul.f32 %v1605_v16, %v1362_v36 }
 0x8fa   : > { %v1364_v39 = vadd.f32 %v1605_v16, %v1363_v37 }
 0x8fc   : > { %v1366_v40 = vsel %vm1365_vm9, %v1605_v16, %v1364_v39 }
 0x8fd   : > { %v1367_v41 = vmul.f32 %v1366_v40, %v1359_v38 }
 0x8ff   : > { %1368 = vst.msk [vmem:[%s2101_s14] sm:$0xff] %vm1335_vm5, %v1367_v41 }
 0x900 PF: > { %s26_s18 = sadd.s32 1, %s1612_s18  }
 0x901   : > { %p23_p6 = scmp.ge.s32.totalorder %s26_s18, 10  }
 0x903   :  { %25 = sbr.rel (!%p23_p6) target bundleno = 1 (0x1), region = 125 }

</bundles_post_ra>
